<compile_context>
chip_gen: v7x
topology: tpu7x:2x2x1
jax: 0.10.0
libtpu: 0.0.40
codegen_flags: <defaults>
</compile_context>

<pallas_src>
import functools
import math

import jax
import jax.numpy as jnp
from jax.experimental import pallas as pl
from jax.experimental.pallas import tpu as pltpu  # noqa: F401  (kept for parity)

# ----------------------------- "config" -------------------------------------
HIDDEN = 32          # config.hidden_size
NUM_HEADS = 4        # config.num_attention_heads
HEAD_DIM = HIDDEN // NUM_HEADS
INTERMEDIATE = 64    # config.intermediate_size
INIT_RANGE = 0.02    # config.initializer_range
LN_EPS = 1e-5        # config.layer_norm_eps
COUNT = 2            # HSUM(count=2, ...)
BATCH = 2
SEQ = 8


# ----------------------------- fused kernel ---------------------------------
def _layernorm(h, gamma, beta, eps):
    mean = jnp.mean(h, axis=-1, keepdims=True)
    c = h - mean
    var = jnp.mean(c * c, axis=-1, keepdims=True)
    return c * jax.lax.rsqrt(var + eps) * gamma + beta


def _hsum_kernel(layers_ref, mask_ref, w1_ref, ow_ref, small_ref, *out_refs,
                 count, num_heads, head_dim, intermediate, eps,
                 write_per_layer):
    """Single grid step: whole HSUM forward on the (B*S, H) slab, in VMEM."""
    hidden = num_heads * head_dim
    bs = layers_ref.shape[1]                     # B * S rows
    scale = 1.0 / math.sqrt(head_dim)
    inv_sqrt2 = 1.0 / math.sqrt(2.0)

    avg_ref = out_refs[0]
    per_layer_ref = out_refs[1] if write_per_layer else None

    # Block-diagonal additive mask, built in the wrapper; loaded ONCE,
    # already (B*S, B*S) so no broadcast inside the head/layer loops.
    mask = mask_ref[...]

    output = jnp.zeros((bs, hidden), jnp.float32)
    acc = jnp.zeros((bs, hidden), jnp.float32)

    for i in range(count):                       # static (count == 2)
        # output = output + layers[-i-1]
        output = output + layers_ref[count - 1 - i].astype(jnp.float32)
        x = output                               # (BS, H) f32

        # ---- packed weights / small params for layer i ---------------------
        w1 = w1_ref[i]                           # (H, 3H + H + I) bf16
        qkv_w = w1[:, :3 * hidden]               # (H, 3H)
        ao_w = w1[:, 3 * hidden:4 * hidden]      # (H, H)
        i_w = w1[:, 4 * hidden:4 * hidden + intermediate]   # (H, I)
        o_w = ow_ref[i]                          # (I, H) bf16

        sm = small_ref[i]                        # (8, 96) f32
        qkv_b = sm[0:1, :3 * hidden]
        ao_b = sm[1:2, :hidden]
        ln1_g = sm[2:3, :hidden]
        ln1_b = sm[3:4, :hidden]
        i_b = sm[4:5, :intermediate]
        o_b = sm[5:6, :hidden]
        ln2_g = sm[6:7, :hidden]
        ln2_b = sm[7:8, :hidden]

        # ---------------- self-attention ------------------------------------
        # Fused Q/K/V projection: one (BS,H) x (H,3H) bf16 MXU push, f32 acc.
        qkv = jnp.dot(x.astype(jnp.bfloat16), qkv_w,
                      preferred_element_type=jnp.float32) + qkv_b

        ctx_parts = []
        for h in range(num_heads):               # static (4 heads)
            lo = h * head_dim
            q = qkv[:, lo:lo + head_dim]                            # (BS, D)
            k = qkv[:, hidden + lo:hidden + lo + head_dim]          # (BS, D)
            v = qkv[:, 2 * hidden + lo:2 * hidden + lo + head_dim]  # (BS, D)

            s = jax.lax.dot_general(q, k, (((1,), (1,)), ((), ())),
                                    preferred_element_type=jnp.float32)
            s = s * scale + mask                 # (BS, BS), block-diag masked
            s = s - jnp.max(s, axis=-1, keepdims=True)
            p = jnp.exp(s)
            p = p * pl.reciprocal(jnp.sum(p, axis=-1, keepdims=True),
                                  approx=True)
            ctx_parts.append(jnp.dot(p, v,
                                     preferred_element_type=jnp.float32))

        # Lane-concat the per-head contexts (XLU shifts, otherwise idle slot)
        # and run ONE attention-output dense instead of 4 serialized pushes.
        ctx = jnp.concatenate(ctx_parts, axis=-1)                  # (BS, H)
        attn = jnp.dot(ctx.astype(jnp.bfloat16), ao_w,
                       preferred_element_type=jnp.float32) + ao_b
        h1 = _layernorm(attn + x, ln1_g, ln1_b, eps)

        # ---------------- feed-forward ---------------------------------------
        inter = jnp.dot(h1.astype(jnp.bfloat16), i_w,
                        preferred_element_type=jnp.float32) + i_b
        # Exact (erf) GELU — matches HF "gelu".  (Tanh-approx would move this
        # to the EUP slot but changes numerics; kept exact.)
        inter = 0.5 * inter * (1.0 + jax.lax.erf(inter * inv_sqrt2))
        ffn = jnp.dot(inter.astype(jnp.bfloat16), o_w,
                      preferred_element_type=jnp.float32) + o_b
        output = _layernorm(ffn + h1, ln2_g, ln2_b, eps)

        if write_per_layer:
            per_layer_ref[i] = output.astype(per_layer_ref.dtype)  # logitses[i]
        acc = acc + output

    avg_ref[...] = (acc * (1.0 / count)).astype(avg_ref.dtype)


# ----------------------------- wrapper ---------------------------------------
@functools.partial(jax.jit, static_argnames=("return_list",))
def hsum_forward(layers_stack, attention_mask, params, return_list=False):
    """layers_stack: (count, B, S, HIDDEN)  (== torch list `layers`, stacked).
    attention_mask: (B, 1, 1, S) HF-style additive mask.
    params: packed / pre-transposed weights from stack_params()."""
    count, B, S, H = layers_stack.shape
    BS = B * S

    # Fold batch into the matmul M dimension: one (B*S, H) slab.
    layers_flat = layers_stack.reshape(count, BS, H)

    # Block-diagonal additive mask: key-padding within a batch element,
    # -1e9 on every cross-batch block so attention cannot leak across batch.
    key_mask = attention_mask.reshape(B, S).astype(jnp.float32)       # (B, S)
    eye = jnp.eye(B, dtype=jnp.float32)
    block = jnp.where(eye > 0.5, 0.0, -1e9).astype(jnp.float32)       # (B, B)
    mask4 = block[:, None, :, None] + key_mask[None, None, :, :]      # (B,1,B,S)
    mask = jnp.broadcast_to(mask4, (B, S, B, S)).reshape(BS, BS)

    w1 = params["w1"]          # (count, H, 3H + H + I) bf16
    o_w = params["o_w"]        # (count, I, H)          bf16
    small = params["small"]    # (count, 8, 96)         f32

    kernel = functools.partial(
        _hsum_kernel, count=count, num_heads=NUM_HEADS, head_dim=HEAD_DIM,
        intermediate=INTERMEDIATE, eps=LN_EPS, write_per_layer=return_list)

    if return_list:
        out_shape = (jax.ShapeDtypeStruct((BS, H), layers_stack.dtype),
                     jax.ShapeDtypeStruct((count, BS, H), layers_stack.dtype))
    else:
        out_shape = jax.ShapeDtypeStruct((BS, H), layers_stack.dtype)

    # grid=() : single kernel step, all (tiny) operands fully resident in VMEM
    # (~0.2 MB total — far under the scoped VMEM limit on v5e/v6e/v7x, so no
    # vmem_limit_bytes / tiling is needed on any generation).
    out = pl.pallas_call(kernel, out_shape=out_shape)(
        layers_flat, mask, w1, o_w, small)

    if return_list:
        _, per_layer = out
        return [per_layer[i].reshape(B, S, H) for i in range(count)]
    return out.reshape(B, S, H)


# ----------------------------- parameter init --------------------------------
def init_layer_params(key):
    """torch-style per-layer parameters (Linear weights are (N, K))."""
    ks = jax.random.split(key, 6)

    def w(k, shape):
        return jax.random.normal(k, shape, jnp.float32) * INIT_RANGE

    z = lambda n: jnp.zeros((n,), jnp.float32)
    o = lambda n: jnp.ones((n,), jnp.float32)
    return dict(
        q_w=w(ks[0], (HIDDEN, HIDDEN)), q_b=z(HIDDEN),
        k_w=w(ks[1], (HIDDEN, HIDDEN)), k_b=z(HIDDEN),
        v_w=w(ks[2], (HIDDEN, HIDDEN)), v_b=z(HIDDEN),
        ao_w=w(ks[3], (HIDDEN, HIDDEN)), ao_b=z(HIDDEN),
        ln1_g=o(HIDDEN), ln1_b=z(HIDDEN),
        i_w=w(ks[4], (INTERMEDIATE, HIDDEN)), i_b=z(INTERMEDIATE),
        o_w=w(ks[5], (HIDDEN, INTERMEDIATE)), o_b=z(HIDDEN),
        ln2_g=o(HIDDEN), ln2_b=z(HIDDEN),
    )


def stack_params(params_list):
    """Pack per-layer torch-style params into fused, pre-transposed (K, N)
    slabs (done once, outside the hot path):
       w1    (count, H, 3H+H+I)  bf16   [QKV^T | AO^T | I^T] lane-concat
       o_w   (count, I, H)       bf16
       small (count, 8, 96)      f32    rows: qkv_b, ao_b, ln1_g, ln1_b,
                                              i_b, o_b, ln2_g, ln2_b (padded)
    """
    w1 = jnp.stack([
        jnp.concatenate([p['q_w'].T, p['k_w'].T, p['v_w'].T,
                         p['ao_w'].T, p['i_w'].T], axis=1)
        for p in params_list]).astype(jnp.bfloat16)            # (C, H, 3H+H+I)
    o_w = jnp.stack([p['o_w'].T for p in params_list]
                    ).astype(jnp.bfloat16)                      # (C, I, H)

    width = 3 * HIDDEN  # 96 (widest small param: concatenated QKV bias)

    def pad(v):
        return jnp.pad(v, (0, width - v.shape[0]))

    small = jnp.stack([jnp.stack([
        pad(jnp.concatenate([p['q_b'], p['k_b'], p['v_b']])),
        pad(p['ao_b']),
        pad(p['ln1_g']),
        pad(p['ln1_b']),
        pad(p['i_b']),
        pad(p['o_b']),
        pad(p['ln2_g']),
        pad(p['ln2_b']),
    ]) for p in params_list]).astype(jnp.float32)               # (C, 8, 96)

    return dict(w1=w1, o_w=o_w, small=small)


# ----------------------------- main ------------------------------------------
if __name__ == "__main__":
    key = jax.random.PRNGKey(0)
    k_layers, k_params = jax.random.split(key)

    # `layers`: list (here stacked) of encoder hidden-states, one per layer.
    layers_stack = jax.random.normal(
        k_layers, (COUNT, BATCH, SEQ, HIDDEN), jnp.float32)

    # HF-style extended additive attention mask (0 = attend, -1e9 = masked),
    # shape (B, 1, 1, S); batch 1 has its last two tokens masked out.
    pad_mask = jnp.zeros((BATCH, SEQ), jnp.float32).at[1, -2:].set(-1e9)
    attn_mask = pad_mask.reshape(BATCH, 1, 1, SEQ)

    params_list = [init_layer_params(k)
                   for k in jax.random.split(k_params, COUNT)]
    stacked = stack_params(params_list)

    # Default path: averaged logits only (no per-layer HBM writeback).
    out = hsum_forward(layers_stack, attn_mask, stacked)
    jax.block_until_ready(out)
    assert out.shape == (BATCH, SEQ, HIDDEN)

    # return_list path: per-layer logits (exercises the optional output).
    logitses = hsum_forward(layers_stack, attn_mask, stacked, return_list=True)
    jax.block_until_ready(logitses)
    assert len(logitses) == COUNT and logitses[0].shape == (BATCH, SEQ, HIDDEN)

    print("KERNEL_OK")
</pallas_src>

<mosaic_0001>
module attributes {stable_mosaic.version = 11 : i64} {
  func.func @_hsum_kernel(%arg0: memref<2x16x32xf32, #tpu.memory_space<vmem>>, %arg1: memref<16x16xf32, #tpu.memory_space<vmem>>, %arg2: memref<2x32x192xbf16, #tpu.memory_space<vmem>>, %arg3: memref<2x64x32xbf16, #tpu.memory_space<vmem>>, %arg4: memref<2x8x96xf32, #tpu.memory_space<vmem>>, %arg5: memref<16x32xf32, #tpu.memory_space<vmem>>) attributes {dimension_semantics = [], scalar_prefetch = 0 : i64, scratch_operands = 0 : i64, tpu.core_type = #tpu.core_type<tc>} {
    %c0 = arith.constant 0 : index
    %c0_0 = arith.constant 0 : index
    %0 = vector.load %arg1[%c0, %c0_0] : memref<16x16xf32, #tpu.memory_space<vmem>>, vector<16x16xf32>
    %cst = arith.constant 0.000000e+00 : f32
    %1 = vector.broadcast %cst : f32 to vector<16x32xf32>
    %cst_1 = arith.constant 0.000000e+00 : f32
    %2 = vector.broadcast %cst_1 : f32 to vector<16x32xf32>
    %c1 = arith.constant 1 : index
    %c0_2 = arith.constant 0 : index
    %c0_3 = arith.constant 0 : index
    %3 = vector.load %arg0[%c1, %c0_2, %c0_3] : memref<2x16x32xf32, #tpu.memory_space<vmem>>, vector<1x16x32xf32>
    %4 = vector.shape_cast %3 : vector<1x16x32xf32> to vector<16x32xf32>
    %5 = arith.addf %1, %4 : vector<16x32xf32>
    %c0_4 = arith.constant 0 : index
    %c0_5 = arith.constant 0 : index
    %c0_6 = arith.constant 0 : index
    %6 = vector.load %arg2[%c0_4, %c0_5, %c0_6] : memref<2x32x192xbf16, #tpu.memory_space<vmem>>, vector<1x32x192xbf16>
    %7 = vector.shape_cast %6 : vector<1x32x192xbf16> to vector<32x192xbf16>
    %8 = vector.extract_strided_slice %7 {offsets = [0, 0], sizes = [32, 96], strides = [1, 1]} : vector<32x192xbf16> to vector<32x96xbf16>
    %9 = vector.extract_strided_slice %7 {offsets = [0, 96], sizes = [32, 32], strides = [1, 1]} : vector<32x192xbf16> to vector<32x32xbf16>
    %10 = vector.extract_strided_slice %7 {offsets = [0, 128], sizes = [32, 64], strides = [1, 1]} : vector<32x192xbf16> to vector<32x64xbf16>
    %c0_7 = arith.constant 0 : index
    %c0_8 = arith.constant 0 : index
    %c0_9 = arith.constant 0 : index
    %11 = vector.load %arg3[%c0_7, %c0_8, %c0_9] : memref<2x64x32xbf16, #tpu.memory_space<vmem>>, vector<1x64x32xbf16>
    %12 = vector.shape_cast %11 : vector<1x64x32xbf16> to vector<64x32xbf16>
    %c0_10 = arith.constant 0 : index
    %c0_11 = arith.constant 0 : index
    %c0_12 = arith.constant 0 : index
    %13 = vector.load %arg4[%c0_10, %c0_11, %c0_12] : memref<2x8x96xf32, #tpu.memory_space<vmem>>, vector<1x8x96xf32>
    %14 = vector.shape_cast %13 : vector<1x8x96xf32> to vector<8x96xf32>
    %15 = vector.extract_strided_slice %14 {offsets = [0, 0], sizes = [1, 96], strides = [1, 1]} : vector<8x96xf32> to vector<1x96xf32>
    %16 = vector.extract_strided_slice %14 {offsets = [1, 0], sizes = [1, 32], strides = [1, 1]} : vector<8x96xf32> to vector<1x32xf32>
    %17 = vector.extract_strided_slice %14 {offsets = [2, 0], sizes = [1, 32], strides = [1, 1]} : vector<8x96xf32> to vector<1x32xf32>
    %18 = vector.extract_strided_slice %14 {offsets = [3, 0], sizes = [1, 32], strides = [1, 1]} : vector<8x96xf32> to vector<1x32xf32>
    %19 = vector.extract_strided_slice %14 {offsets = [4, 0], sizes = [1, 64], strides = [1, 1]} : vector<8x96xf32> to vector<1x64xf32>
    %20 = vector.extract_strided_slice %14 {offsets = [5, 0], sizes = [1, 32], strides = [1, 1]} : vector<8x96xf32> to vector<1x32xf32>
    %21 = vector.extract_strided_slice %14 {offsets = [6, 0], sizes = [1, 32], strides = [1, 1]} : vector<8x96xf32> to vector<1x32xf32>
    %22 = vector.extract_strided_slice %14 {offsets = [7, 0], sizes = [1, 32], strides = [1, 1]} : vector<8x96xf32> to vector<1x32xf32>
    %23 = arith.truncf %5 : vector<16x32xf32> to vector<16x32xbf16>
    %cst_13 = arith.constant dense<0.000000e+00> : vector<16x96xf32>
    %24 = tpu.matmul %23, %8, %cst_13 {dimension_numbers = #tpu.dot_dimension_numbers<[1], [0], [0], [1], [0, 0, 1, 1], [], []>} : vector<16x32xbf16>, vector<32x96xbf16>, vector<16x96xf32> -> vector<16x96xf32>
    %25 = vector.broadcast %15 : vector<1x96xf32> to vector<16x96xf32>
    %26 = arith.addf %24, %25 : vector<16x96xf32>
    %27 = vector.extract_strided_slice %26 {offsets = [0, 0], sizes = [16, 8], strides = [1, 1]} : vector<16x96xf32> to vector<16x8xf32>
    %28 = vector.extract_strided_slice %26 {offsets = [0, 32], sizes = [16, 8], strides = [1, 1]} : vector<16x96xf32> to vector<16x8xf32>
    %29 = vector.extract_strided_slice %26 {offsets = [0, 64], sizes = [16, 8], strides = [1, 1]} : vector<16x96xf32> to vector<16x8xf32>
    %cst_14 = arith.constant dense<0.000000e+00> : vector<16x16xf32>
    %30 = tpu.matmul %27, %28, %cst_14 {dimension_numbers = #tpu.dot_dimension_numbers<[1], [1], [0], [0], [0, 0, 1, 0], [], []>} : vector<16x8xf32>, vector<16x8xf32>, vector<16x16xf32> -> vector<16x16xf32>
    %cst_15 = arith.constant 0.353553385 : f32
    %31 = vector.broadcast %cst_15 : f32 to vector<16x16xf32>
    %32 = arith.mulf %30, %31 : vector<16x16xf32>
    %33 = arith.addf %32, %0 : vector<16x16xf32>
    %cst_16 = arith.constant dense<0xFF800000> : vector<16xf32>
    %34 = vector.multi_reduction <maximumf>, %33, %cst_16 [1] : vector<16x16xf32> to vector<16xf32>
    %35 = vector.shape_cast %34 : vector<16xf32> to vector<16x1xf32>
    %36 = vector.broadcast %35 : vector<16x1xf32> to vector<16x16xf32>
    %37 = arith.subf %33, %36 : vector<16x16xf32>
    %38 = math.exp %37 : vector<16x16xf32>
    %cst_17 = arith.constant dense<0.000000e+00> : vector<16xf32>
    %39 = vector.multi_reduction <add>, %38, %cst_17 [1] : vector<16x16xf32> to vector<16xf32>
    %40 = vector.shape_cast %39 : vector<16xf32> to vector<16x1xf32>
    %41 = tpu.reciprocal %40 {approx = true} : vector<16x1xf32> -> vector<16x1xf32>
    %42 = vector.broadcast %41 : vector<16x1xf32> to vector<16x16xf32>
    %43 = arith.mulf %38, %42 : vector<16x16xf32>
    %cst_18 = arith.constant dense<0.000000e+00> : vector<16x8xf32>
    %44 = tpu.matmul %43, %29, %cst_18 {dimension_numbers = #tpu.dot_dimension_numbers<[1], [0], [0], [1], [0, 0, 1, 1], [], []>} : vector<16x16xf32>, vector<16x8xf32>, vector<16x8xf32> -> vector<16x8xf32>
    %45 = vector.extract_strided_slice %26 {offsets = [0, 8], sizes = [16, 8], strides = [1, 1]} : vector<16x96xf32> to vector<16x8xf32>
    %46 = vector.extract_strided_slice %26 {offsets = [0, 40], sizes = [16, 8], strides = [1, 1]} : vector<16x96xf32> to vector<16x8xf32>
    %47 = vector.extract_strided_slice %26 {offsets = [0, 72], sizes = [16, 8], strides = [1, 1]} : vector<16x96xf32> to vector<16x8xf32>
    %cst_19 = arith.constant dense<0.000000e+00> : vector<16x16xf32>
    %48 = tpu.matmul %45, %46, %cst_19 {dimension_numbers = #tpu.dot_dimension_numbers<[1], [1], [0], [0], [0, 0, 1, 0], [], []>} : vector<16x8xf32>, vector<16x8xf32>, vector<16x16xf32> -> vector<16x16xf32>
    %cst_20 = arith.constant 0.353553385 : f32
    %49 = vector.broadcast %cst_20 : f32 to vector<16x16xf32>
    %50 = arith.mulf %48, %49 : vector<16x16xf32>
    %51 = arith.addf %50, %0 : vector<16x16xf32>
    %cst_21 = arith.constant dense<0xFF800000> : vector<16xf32>
    %52 = vector.multi_reduction <maximumf>, %51, %cst_21 [1] : vector<16x16xf32> to vector<16xf32>
    %53 = vector.shape_cast %52 : vector<16xf32> to vector<16x1xf32>
    %54 = vector.broadcast %53 : vector<16x1xf32> to vector<16x16xf32>
    %55 = arith.subf %51, %54 : vector<16x16xf32>
    %56 = math.exp %55 : vector<16x16xf32>
    %cst_22 = arith.constant dense<0.000000e+00> : vector<16xf32>
    %57 = vector.multi_reduction <add>, %56, %cst_22 [1] : vector<16x16xf32> to vector<16xf32>
    %58 = vector.shape_cast %57 : vector<16xf32> to vector<16x1xf32>
    %59 = tpu.reciprocal %58 {approx = true} : vector<16x1xf32> -> vector<16x1xf32>
    %60 = vector.broadcast %59 : vector<16x1xf32> to vector<16x16xf32>
    %61 = arith.mulf %56, %60 : vector<16x16xf32>
    %cst_23 = arith.constant dense<0.000000e+00> : vector<16x8xf32>
    %62 = tpu.matmul %61, %47, %cst_23 {dimension_numbers = #tpu.dot_dimension_numbers<[1], [0], [0], [1], [0, 0, 1, 1], [], []>} : vector<16x16xf32>, vector<16x8xf32>, vector<16x8xf32> -> vector<16x8xf32>
    %63 = vector.extract_strided_slice %26 {offsets = [0, 16], sizes = [16, 8], strides = [1, 1]} : vector<16x96xf32> to vector<16x8xf32>
    %64 = vector.extract_strided_slice %26 {offsets = [0, 48], sizes = [16, 8], strides = [1, 1]} : vector<16x96xf32> to vector<16x8xf32>
    %65 = vector.extract_strided_slice %26 {offsets = [0, 80], sizes = [16, 8], strides = [1, 1]} : vector<16x96xf32> to vector<16x8xf32>
    %cst_24 = arith.constant dense<0.000000e+00> : vector<16x16xf32>
    %66 = tpu.matmul %63, %64, %cst_24 {dimension_numbers = #tpu.dot_dimension_numbers<[1], [1], [0], [0], [0, 0, 1, 0], [], []>} : vector<16x8xf32>, vector<16x8xf32>, vector<16x16xf32> -> vector<16x16xf32>
    %cst_25 = arith.constant 0.353553385 : f32
    %67 = vector.broadcast %cst_25 : f32 to vector<16x16xf32>
    %68 = arith.mulf %66, %67 : vector<16x16xf32>
    %69 = arith.addf %68, %0 : vector<16x16xf32>
    %cst_26 = arith.constant dense<0xFF800000> : vector<16xf32>
    %70 = vector.multi_reduction <maximumf>, %69, %cst_26 [1] : vector<16x16xf32> to vector<16xf32>
    %71 = vector.shape_cast %70 : vector<16xf32> to vector<16x1xf32>
    %72 = vector.broadcast %71 : vector<16x1xf32> to vector<16x16xf32>
    %73 = arith.subf %69, %72 : vector<16x16xf32>
    %74 = math.exp %73 : vector<16x16xf32>
    %cst_27 = arith.constant dense<0.000000e+00> : vector<16xf32>
    %75 = vector.multi_reduction <add>, %74, %cst_27 [1] : vector<16x16xf32> to vector<16xf32>
    %76 = vector.shape_cast %75 : vector<16xf32> to vector<16x1xf32>
    %77 = tpu.reciprocal %76 {approx = true} : vector<16x1xf32> -> vector<16x1xf32>
    %78 = vector.broadcast %77 : vector<16x1xf32> to vector<16x16xf32>
    %79 = arith.mulf %74, %78 : vector<16x16xf32>
    %cst_28 = arith.constant dense<0.000000e+00> : vector<16x8xf32>
    %80 = tpu.matmul %79, %65, %cst_28 {dimension_numbers = #tpu.dot_dimension_numbers<[1], [0], [0], [1], [0, 0, 1, 1], [], []>} : vector<16x16xf32>, vector<16x8xf32>, vector<16x8xf32> -> vector<16x8xf32>
    %81 = vector.extract_strided_slice %26 {offsets = [0, 24], sizes = [16, 8], strides = [1, 1]} : vector<16x96xf32> to vector<16x8xf32>
    %82 = vector.extract_strided_slice %26 {offsets = [0, 56], sizes = [16, 8], strides = [1, 1]} : vector<16x96xf32> to vector<16x8xf32>
    %83 = vector.extract_strided_slice %26 {offsets = [0, 88], sizes = [16, 8], strides = [1, 1]} : vector<16x96xf32> to vector<16x8xf32>
    %cst_29 = arith.constant dense<0.000000e+00> : vector<16x16xf32>
    %84 = tpu.matmul %81, %82, %cst_29 {dimension_numbers = #tpu.dot_dimension_numbers<[1], [1], [0], [0], [0, 0, 1, 0], [], []>} : vector<16x8xf32>, vector<16x8xf32>, vector<16x16xf32> -> vector<16x16xf32>
    %cst_30 = arith.constant 0.353553385 : f32
    %85 = vector.broadcast %cst_30 : f32 to vector<16x16xf32>
    %86 = arith.mulf %84, %85 : vector<16x16xf32>
    %87 = arith.addf %86, %0 : vector<16x16xf32>
    %cst_31 = arith.constant dense<0xFF800000> : vector<16xf32>
    %88 = vector.multi_reduction <maximumf>, %87, %cst_31 [1] : vector<16x16xf32> to vector<16xf32>
    %89 = vector.shape_cast %88 : vector<16xf32> to vector<16x1xf32>
    %90 = vector.broadcast %89 : vector<16x1xf32> to vector<16x16xf32>
    %91 = arith.subf %87, %90 : vector<16x16xf32>
    %92 = math.exp %91 : vector<16x16xf32>
    %cst_32 = arith.constant dense<0.000000e+00> : vector<16xf32>
    %93 = vector.multi_reduction <add>, %92, %cst_32 [1] : vector<16x16xf32> to vector<16xf32>
    %94 = vector.shape_cast %93 : vector<16xf32> to vector<16x1xf32>
    %95 = tpu.reciprocal %94 {approx = true} : vector<16x1xf32> -> vector<16x1xf32>
    %96 = vector.broadcast %95 : vector<16x1xf32> to vector<16x16xf32>
    %97 = arith.mulf %92, %96 : vector<16x16xf32>
    %cst_33 = arith.constant dense<0.000000e+00> : vector<16x8xf32>
    %98 = tpu.matmul %97, %83, %cst_33 {dimension_numbers = #tpu.dot_dimension_numbers<[1], [0], [0], [1], [0, 0, 1, 1], [], []>} : vector<16x16xf32>, vector<16x8xf32>, vector<16x8xf32> -> vector<16x8xf32>
    %99 = tpu.concatenate %44, %62, %80, %98 in 1 : vector<16x8xf32>, vector<16x8xf32>, vector<16x8xf32>, vector<16x8xf32> -> vector<16x32xf32>
    %100 = arith.truncf %99 : vector<16x32xf32> to vector<16x32xbf16>
    %cst_34 = arith.constant dense<0.000000e+00> : vector<16x32xf32>
    %101 = tpu.matmul %100, %9, %cst_34 {dimension_numbers = #tpu.dot_dimension_numbers<[1], [0], [0], [1], [0, 0, 1, 1], [], []>} : vector<16x32xbf16>, vector<32x32xbf16>, vector<16x32xf32> -> vector<16x32xf32>
    %102 = vector.broadcast %16 : vector<1x32xf32> to vector<16x32xf32>
    %103 = arith.addf %101, %102 : vector<16x32xf32>
    %104 = arith.addf %103, %5 : vector<16x32xf32>
    %cst_35 = arith.constant dense<0.000000e+00> : vector<16xf32>
    %105 = vector.multi_reduction <add>, %104, %cst_35 [1] : vector<16x32xf32> to vector<16xf32>
    %106 = vector.shape_cast %105 : vector<16xf32> to vector<16x1xf32>
    %cst_36 = arith.constant 3.200000e+01 : f32
    %107 = vector.broadcast %cst_36 : f32 to vector<16x1xf32>
    %108 = arith.divf %106, %107 : vector<16x1xf32>
    %109 = vector.broadcast %108 : vector<16x1xf32> to vector<16x32xf32>
    %110 = arith.subf %104, %109 : vector<16x32xf32>
    %111 = arith.mulf %110, %110 : vector<16x32xf32>
    %cst_37 = arith.constant dense<0.000000e+00> : vector<16xf32>
    %112 = vector.multi_reduction <add>, %111, %cst_37 [1] : vector<16x32xf32> to vector<16xf32>
    %113 = vector.shape_cast %112 : vector<16xf32> to vector<16x1xf32>
    %cst_38 = arith.constant 3.200000e+01 : f32
    %114 = vector.broadcast %cst_38 : f32 to vector<16x1xf32>
    %115 = arith.divf %113, %114 : vector<16x1xf32>
    %cst_39 = arith.constant 9.99999974E-6 : f32
    %116 = vector.broadcast %cst_39 : f32 to vector<16x1xf32>
    %117 = arith.addf %115, %116 : vector<16x1xf32>
    %118 = math.rsqrt %117 : vector<16x1xf32>
    %119 = vector.broadcast %118 : vector<16x1xf32> to vector<16x32xf32>
    %120 = arith.mulf %110, %119 : vector<16x32xf32>
    %121 = vector.broadcast %17 : vector<1x32xf32> to vector<16x32xf32>
    %122 = arith.mulf %120, %121 : vector<16x32xf32>
    %123 = vector.broadcast %18 : vector<1x32xf32> to vector<16x32xf32>
    %124 = arith.addf %122, %123 : vector<16x32xf32>
    %125 = arith.truncf %124 : vector<16x32xf32> to vector<16x32xbf16>
    %cst_40 = arith.constant dense<0.000000e+00> : vector<16x64xf32>
    %126 = tpu.matmul %125, %10, %cst_40 {dimension_numbers = #tpu.dot_dimension_numbers<[1], [0], [0], [1], [0, 0, 1, 1], [], []>} : vector<16x32xbf16>, vector<32x64xbf16>, vector<16x64xf32> -> vector<16x64xf32>
    %127 = vector.broadcast %19 : vector<1x64xf32> to vector<16x64xf32>
    %128 = arith.addf %126, %127 : vector<16x64xf32>
    %cst_41 = arith.constant 5.000000e-01 : f32
    %129 = vector.broadcast %cst_41 : f32 to vector<16x64xf32>
    %130 = arith.mulf %129, %128 : vector<16x64xf32>
    %cst_42 = arith.constant 0.707106769 : f32
    %131 = vector.broadcast %cst_42 : f32 to vector<16x64xf32>
    %132 = arith.mulf %128, %131 : vector<16x64xf32>
    %133 = math.erf %132 : vector<16x64xf32>
    %cst_43 = arith.constant 1.000000e+00 : f32
    %134 = vector.broadcast %cst_43 : f32 to vector<16x64xf32>
    %135 = arith.addf %134, %133 : vector<16x64xf32>
    %136 = arith.mulf %130, %135 : vector<16x64xf32>
    %137 = arith.truncf %136 : vector<16x64xf32> to vector<16x64xbf16>
    %cst_44 = arith.constant dense<0.000000e+00> : vector<16x32xf32>
    %138 = tpu.matmul %137, %12, %cst_44 {dimension_numbers = #tpu.dot_dimension_numbers<[1], [0], [0], [1], [0, 0, 1, 1], [], []>} : vector<16x64xbf16>, vector<64x32xbf16>, vector<16x32xf32> -> vector<16x32xf32>
    %139 = vector.broadcast %20 : vector<1x32xf32> to vector<16x32xf32>
    %140 = arith.addf %138, %139 : vector<16x32xf32>
    %141 = arith.addf %140, %124 : vector<16x32xf32>
    %cst_45 = arith.constant dense<0.000000e+00> : vector<16xf32>
    %142 = vector.multi_reduction <add>, %141, %cst_45 [1] : vector<16x32xf32> to vector<16xf32>
    %143 = vector.shape_cast %142 : vector<16xf32> to vector<16x1xf32>
    %cst_46 = arith.constant 3.200000e+01 : f32
    %144 = vector.broadcast %cst_46 : f32 to vector<16x1xf32>
    %145 = arith.divf %143, %144 : vector<16x1xf32>
    %146 = vector.broadcast %145 : vector<16x1xf32> to vector<16x32xf32>
    %147 = arith.subf %141, %146 : vector<16x32xf32>
    %148 = arith.mulf %147, %147 : vector<16x32xf32>
    %cst_47 = arith.constant dense<0.000000e+00> : vector<16xf32>
    %149 = vector.multi_reduction <add>, %148, %cst_47 [1] : vector<16x32xf32> to vector<16xf32>
    %150 = vector.shape_cast %149 : vector<16xf32> to vector<16x1xf32>
    %cst_48 = arith.constant 3.200000e+01 : f32
    %151 = vector.broadcast %cst_48 : f32 to vector<16x1xf32>
    %152 = arith.divf %150, %151 : vector<16x1xf32>
    %cst_49 = arith.constant 9.99999974E-6 : f32
    %153 = vector.broadcast %cst_49 : f32 to vector<16x1xf32>
    %154 = arith.addf %152, %153 : vector<16x1xf32>
    %155 = math.rsqrt %154 : vector<16x1xf32>
    %156 = vector.broadcast %155 : vector<16x1xf32> to vector<16x32xf32>
    %157 = arith.mulf %147, %156 : vector<16x32xf32>
    %158 = vector.broadcast %21 : vector<1x32xf32> to vector<16x32xf32>
    %159 = arith.mulf %157, %158 : vector<16x32xf32>
    %160 = vector.broadcast %22 : vector<1x32xf32> to vector<16x32xf32>
    %161 = arith.addf %159, %160 : vector<16x32xf32>
    %162 = arith.addf %2, %161 : vector<16x32xf32>
    %c0_50 = arith.constant 0 : index
    %c0_51 = arith.constant 0 : index
    %c0_52 = arith.constant 0 : index
    %163 = vector.load %arg0[%c0_50, %c0_51, %c0_52] : memref<2x16x32xf32, #tpu.memory_space<vmem>>, vector<1x16x32xf32>
    %164 = vector.shape_cast %163 : vector<1x16x32xf32> to vector<16x32xf32>
    %165 = arith.addf %161, %164 : vector<16x32xf32>
    %c1_53 = arith.constant 1 : index
    %c0_54 = arith.constant 0 : index
    %c0_55 = arith.constant 0 : index
    %166 = vector.load %arg2[%c1_53, %c0_54, %c0_55] : memref<2x32x192xbf16, #tpu.memory_space<vmem>>, vector<1x32x192xbf16>
    %167 = vector.shape_cast %166 : vector<1x32x192xbf16> to vector<32x192xbf16>
    %168 = vector.extract_strided_slice %167 {offsets = [0, 0], sizes = [32, 96], strides = [1, 1]} : vector<32x192xbf16> to vector<32x96xbf16>
    %169 = vector.extract_strided_slice %167 {offsets = [0, 96], sizes = [32, 32], strides = [1, 1]} : vector<32x192xbf16> to vector<32x32xbf16>
    %170 = vector.extract_strided_slice %167 {offsets = [0, 128], sizes = [32, 64], strides = [1, 1]} : vector<32x192xbf16> to vector<32x64xbf16>
    %c1_56 = arith.constant 1 : index
    %c0_57 = arith.constant 0 : index
    %c0_58 = arith.constant 0 : index
    %171 = vector.load %arg3[%c1_56, %c0_57, %c0_58] : memref<2x64x32xbf16, #tpu.memory_space<vmem>>, vector<1x64x32xbf16>
    %172 = vector.shape_cast %171 : vector<1x64x32xbf16> to vector<64x32xbf16>
    %c1_59 = arith.constant 1 : index
    %c0_60 = arith.constant 0 : index
    %c0_61 = arith.constant 0 : index
    %173 = vector.load %arg4[%c1_59, %c0_60, %c0_61] : memref<2x8x96xf32, #tpu.memory_space<vmem>>, vector<1x8x96xf32>
    %174 = vector.shape_cast %173 : vector<1x8x96xf32> to vector<8x96xf32>
    %175 = vector.extract_strided_slice %174 {offsets = [0, 0], sizes = [1, 96], strides = [1, 1]} : vector<8x96xf32> to vector<1x96xf32>
    %176 = vector.extract_strided_slice %174 {offsets = [1, 0], sizes = [1, 32], strides = [1, 1]} : vector<8x96xf32> to vector<1x32xf32>
    %177 = vector.extract_strided_slice %174 {offsets = [2, 0], sizes = [1, 32], strides = [1, 1]} : vector<8x96xf32> to vector<1x32xf32>
    %178 = vector.extract_strided_slice %174 {offsets = [3, 0], sizes = [1, 32], strides = [1, 1]} : vector<8x96xf32> to vector<1x32xf32>
    %179 = vector.extract_strided_slice %174 {offsets = [4, 0], sizes = [1, 64], strides = [1, 1]} : vector<8x96xf32> to vector<1x64xf32>
    %180 = vector.extract_strided_slice %174 {offsets = [5, 0], sizes = [1, 32], strides = [1, 1]} : vector<8x96xf32> to vector<1x32xf32>
    %181 = vector.extract_strided_slice %174 {offsets = [6, 0], sizes = [1, 32], strides = [1, 1]} : vector<8x96xf32> to vector<1x32xf32>
    %182 = vector.extract_strided_slice %174 {offsets = [7, 0], sizes = [1, 32], strides = [1, 1]} : vector<8x96xf32> to vector<1x32xf32>
    %183 = arith.truncf %165 : vector<16x32xf32> to vector<16x32xbf16>
    %cst_62 = arith.constant dense<0.000000e+00> : vector<16x96xf32>
    %184 = tpu.matmul %183, %168, %cst_62 {dimension_numbers = #tpu.dot_dimension_numbers<[1], [0], [0], [1], [0, 0, 1, 1], [], []>} : vector<16x32xbf16>, vector<32x96xbf16>, vector<16x96xf32> -> vector<16x96xf32>
    %185 = vector.broadcast %175 : vector<1x96xf32> to vector<16x96xf32>
    %186 = arith.addf %184, %185 : vector<16x96xf32>
    %187 = vector.extract_strided_slice %186 {offsets = [0, 0], sizes = [16, 8], strides = [1, 1]} : vector<16x96xf32> to vector<16x8xf32>
    %188 = vector.extract_strided_slice %186 {offsets = [0, 32], sizes = [16, 8], strides = [1, 1]} : vector<16x96xf32> to vector<16x8xf32>
    %189 = vector.extract_strided_slice %186 {offsets = [0, 64], sizes = [16, 8], strides = [1, 1]} : vector<16x96xf32> to vector<16x8xf32>
    %cst_63 = arith.constant dense<0.000000e+00> : vector<16x16xf32>
    %190 = tpu.matmul %187, %188, %cst_63 {dimension_numbers = #tpu.dot_dimension_numbers<[1], [1], [0], [0], [0, 0, 1, 0], [], []>} : vector<16x8xf32>, vector<16x8xf32>, vector<16x16xf32> -> vector<16x16xf32>
    %cst_64 = arith.constant 0.353553385 : f32
    %191 = vector.broadcast %cst_64 : f32 to vector<16x16xf32>
    %192 = arith.mulf %190, %191 : vector<16x16xf32>
    %193 = arith.addf %192, %0 : vector<16x16xf32>
    %cst_65 = arith.constant dense<0xFF800000> : vector<16xf32>
    %194 = vector.multi_reduction <maximumf>, %193, %cst_65 [1] : vector<16x16xf32> to vector<16xf32>
    %195 = vector.shape_cast %194 : vector<16xf32> to vector<16x1xf32>
    %196 = vector.broadcast %195 : vector<16x1xf32> to vector<16x16xf32>
    %197 = arith.subf %193, %196 : vector<16x16xf32>
    %198 = math.exp %197 : vector<16x16xf32>
    %cst_66 = arith.constant dense<0.000000e+00> : vector<16xf32>
    %199 = vector.multi_reduction <add>, %198, %cst_66 [1] : vector<16x16xf32> to vector<16xf32>
    %200 = vector.shape_cast %199 : vector<16xf32> to vector<16x1xf32>
    %201 = tpu.reciprocal %200 {approx = true} : vector<16x1xf32> -> vector<16x1xf32>
    %202 = vector.broadcast %201 : vector<16x1xf32> to vector<16x16xf32>
    %203 = arith.mulf %198, %202 : vector<16x16xf32>
    %cst_67 = arith.constant dense<0.000000e+00> : vector<16x8xf32>
    %204 = tpu.matmul %203, %189, %cst_67 {dimension_numbers = #tpu.dot_dimension_numbers<[1], [0], [0], [1], [0, 0, 1, 1], [], []>} : vector<16x16xf32>, vector<16x8xf32>, vector<16x8xf32> -> vector<16x8xf32>
    %205 = vector.extract_strided_slice %186 {offsets = [0, 8], sizes = [16, 8], strides = [1, 1]} : vector<16x96xf32> to vector<16x8xf32>
    %206 = vector.extract_strided_slice %186 {offsets = [0, 40], sizes = [16, 8], strides = [1, 1]} : vector<16x96xf32> to vector<16x8xf32>
    %207 = vector.extract_strided_slice %186 {offsets = [0, 72], sizes = [16, 8], strides = [1, 1]} : vector<16x96xf32> to vector<16x8xf32>
    %cst_68 = arith.constant dense<0.000000e+00> : vector<16x16xf32>
    %208 = tpu.matmul %205, %206, %cst_68 {dimension_numbers = #tpu.dot_dimension_numbers<[1], [1], [0], [0], [0, 0, 1, 0], [], []>} : vector<16x8xf32>, vector<16x8xf32>, vector<16x16xf32> -> vector<16x16xf32>
    %cst_69 = arith.constant 0.353553385 : f32
    %209 = vector.broadcast %cst_69 : f32 to vector<16x16xf32>
    %210 = arith.mulf %208, %209 : vector<16x16xf32>
    %211 = arith.addf %210, %0 : vector<16x16xf32>
    %cst_70 = arith.constant dense<0xFF800000> : vector<16xf32>
    %212 = vector.multi_reduction <maximumf>, %211, %cst_70 [1] : vector<16x16xf32> to vector<16xf32>
    %213 = vector.shape_cast %212 : vector<16xf32> to vector<16x1xf32>
    %214 = vector.broadcast %213 : vector<16x1xf32> to vector<16x16xf32>
    %215 = arith.subf %211, %214 : vector<16x16xf32>
    %216 = math.exp %215 : vector<16x16xf32>
    %cst_71 = arith.constant dense<0.000000e+00> : vector<16xf32>
    %217 = vector.multi_reduction <add>, %216, %cst_71 [1] : vector<16x16xf32> to vector<16xf32>
    %218 = vector.shape_cast %217 : vector<16xf32> to vector<16x1xf32>
    %219 = tpu.reciprocal %218 {approx = true} : vector<16x1xf32> -> vector<16x1xf32>
    %220 = vector.broadcast %219 : vector<16x1xf32> to vector<16x16xf32>
    %221 = arith.mulf %216, %220 : vector<16x16xf32>
    %cst_72 = arith.constant dense<0.000000e+00> : vector<16x8xf32>
    %222 = tpu.matmul %221, %207, %cst_72 {dimension_numbers = #tpu.dot_dimension_numbers<[1], [0], [0], [1], [0, 0, 1, 1], [], []>} : vector<16x16xf32>, vector<16x8xf32>, vector<16x8xf32> -> vector<16x8xf32>
    %223 = vector.extract_strided_slice %186 {offsets = [0, 16], sizes = [16, 8], strides = [1, 1]} : vector<16x96xf32> to vector<16x8xf32>
    %224 = vector.extract_strided_slice %186 {offsets = [0, 48], sizes = [16, 8], strides = [1, 1]} : vector<16x96xf32> to vector<16x8xf32>
    %225 = vector.extract_strided_slice %186 {offsets = [0, 80], sizes = [16, 8], strides = [1, 1]} : vector<16x96xf32> to vector<16x8xf32>
    %cst_73 = arith.constant dense<0.000000e+00> : vector<16x16xf32>
    %226 = tpu.matmul %223, %224, %cst_73 {dimension_numbers = #tpu.dot_dimension_numbers<[1], [1], [0], [0], [0, 0, 1, 0], [], []>} : vector<16x8xf32>, vector<16x8xf32>, vector<16x16xf32> -> vector<16x16xf32>
    %cst_74 = arith.constant 0.353553385 : f32
    %227 = vector.broadcast %cst_74 : f32 to vector<16x16xf32>
    %228 = arith.mulf %226, %227 : vector<16x16xf32>
    %229 = arith.addf %228, %0 : vector<16x16xf32>
    %cst_75 = arith.constant dense<0xFF800000> : vector<16xf32>
    %230 = vector.multi_reduction <maximumf>, %229, %cst_75 [1] : vector<16x16xf32> to vector<16xf32>
    %231 = vector.shape_cast %230 : vector<16xf32> to vector<16x1xf32>
    %232 = vector.broadcast %231 : vector<16x1xf32> to vector<16x16xf32>
    %233 = arith.subf %229, %232 : vector<16x16xf32>
    %234 = math.exp %233 : vector<16x16xf32>
    %cst_76 = arith.constant dense<0.000000e+00> : vector<16xf32>
    %235 = vector.multi_reduction <add>, %234, %cst_76 [1] : vector<16x16xf32> to vector<16xf32>
    %236 = vector.shape_cast %235 : vector<16xf32> to vector<16x1xf32>
    %237 = tpu.reciprocal %236 {approx = true} : vector<16x1xf32> -> vector<16x1xf32>
    %238 = vector.broadcast %237 : vector<16x1xf32> to vector<16x16xf32>
    %239 = arith.mulf %234, %238 : vector<16x16xf32>
    %cst_77 = arith.constant dense<0.000000e+00> : vector<16x8xf32>
    %240 = tpu.matmul %239, %225, %cst_77 {dimension_numbers = #tpu.dot_dimension_numbers<[1], [0], [0], [1], [0, 0, 1, 1], [], []>} : vector<16x16xf32>, vector<16x8xf32>, vector<16x8xf32> -> vector<16x8xf32>
    %241 = vector.extract_strided_slice %186 {offsets = [0, 24], sizes = [16, 8], strides = [1, 1]} : vector<16x96xf32> to vector<16x8xf32>
    %242 = vector.extract_strided_slice %186 {offsets = [0, 56], sizes = [16, 8], strides = [1, 1]} : vector<16x96xf32> to vector<16x8xf32>
    %243 = vector.extract_strided_slice %186 {offsets = [0, 88], sizes = [16, 8], strides = [1, 1]} : vector<16x96xf32> to vector<16x8xf32>
    %cst_78 = arith.constant dense<0.000000e+00> : vector<16x16xf32>
    %244 = tpu.matmul %241, %242, %cst_78 {dimension_numbers = #tpu.dot_dimension_numbers<[1], [1], [0], [0], [0, 0, 1, 0], [], []>} : vector<16x8xf32>, vector<16x8xf32>, vector<16x16xf32> -> vector<16x16xf32>
    %cst_79 = arith.constant 0.353553385 : f32
    %245 = vector.broadcast %cst_79 : f32 to vector<16x16xf32>
    %246 = arith.mulf %244, %245 : vector<16x16xf32>
    %247 = arith.addf %246, %0 : vector<16x16xf32>
    %cst_80 = arith.constant dense<0xFF800000> : vector<16xf32>
    %248 = vector.multi_reduction <maximumf>, %247, %cst_80 [1] : vector<16x16xf32> to vector<16xf32>
    %249 = vector.shape_cast %248 : vector<16xf32> to vector<16x1xf32>
    %250 = vector.broadcast %249 : vector<16x1xf32> to vector<16x16xf32>
    %251 = arith.subf %247, %250 : vector<16x16xf32>
    %252 = math.exp %251 : vector<16x16xf32>
    %cst_81 = arith.constant dense<0.000000e+00> : vector<16xf32>
    %253 = vector.multi_reduction <add>, %252, %cst_81 [1] : vector<16x16xf32> to vector<16xf32>
    %254 = vector.shape_cast %253 : vector<16xf32> to vector<16x1xf32>
    %255 = tpu.reciprocal %254 {approx = true} : vector<16x1xf32> -> vector<16x1xf32>
    %256 = vector.broadcast %255 : vector<16x1xf32> to vector<16x16xf32>
    %257 = arith.mulf %252, %256 : vector<16x16xf32>
    %cst_82 = arith.constant dense<0.000000e+00> : vector<16x8xf32>
    %258 = tpu.matmul %257, %243, %cst_82 {dimension_numbers = #tpu.dot_dimension_numbers<[1], [0], [0], [1], [0, 0, 1, 1], [], []>} : vector<16x16xf32>, vector<16x8xf32>, vector<16x8xf32> -> vector<16x8xf32>
    %259 = tpu.concatenate %204, %222, %240, %258 in 1 : vector<16x8xf32>, vector<16x8xf32>, vector<16x8xf32>, vector<16x8xf32> -> vector<16x32xf32>
    %260 = arith.truncf %259 : vector<16x32xf32> to vector<16x32xbf16>
    %cst_83 = arith.constant dense<0.000000e+00> : vector<16x32xf32>
    %261 = tpu.matmul %260, %169, %cst_83 {dimension_numbers = #tpu.dot_dimension_numbers<[1], [0], [0], [1], [0, 0, 1, 1], [], []>} : vector<16x32xbf16>, vector<32x32xbf16>, vector<16x32xf32> -> vector<16x32xf32>
    %262 = vector.broadcast %176 : vector<1x32xf32> to vector<16x32xf32>
    %263 = arith.addf %261, %262 : vector<16x32xf32>
    %264 = arith.addf %263, %165 : vector<16x32xf32>
    %cst_84 = arith.constant dense<0.000000e+00> : vector<16xf32>
    %265 = vector.multi_reduction <add>, %264, %cst_84 [1] : vector<16x32xf32> to vector<16xf32>
    %266 = vector.shape_cast %265 : vector<16xf32> to vector<16x1xf32>
    %cst_85 = arith.constant 3.200000e+01 : f32
    %267 = vector.broadcast %cst_85 : f32 to vector<16x1xf32>
    %268 = arith.divf %266, %267 : vector<16x1xf32>
    %269 = vector.broadcast %268 : vector<16x1xf32> to vector<16x32xf32>
    %270 = arith.subf %264, %269 : vector<16x32xf32>
    %271 = arith.mulf %270, %270 : vector<16x32xf32>
    %cst_86 = arith.constant dense<0.000000e+00> : vector<16xf32>
    %272 = vector.multi_reduction <add>, %271, %cst_86 [1] : vector<16x32xf32> to vector<16xf32>
    %273 = vector.shape_cast %272 : vector<16xf32> to vector<16x1xf32>
    %cst_87 = arith.constant 3.200000e+01 : f32
    %274 = vector.broadcast %cst_87 : f32 to vector<16x1xf32>
    %275 = arith.divf %273, %274 : vector<16x1xf32>
    %cst_88 = arith.constant 9.99999974E-6 : f32
    %276 = vector.broadcast %cst_88 : f32 to vector<16x1xf32>
    %277 = arith.addf %275, %276 : vector<16x1xf32>
    %278 = math.rsqrt %277 : vector<16x1xf32>
    %279 = vector.broadcast %278 : vector<16x1xf32> to vector<16x32xf32>
    %280 = arith.mulf %270, %279 : vector<16x32xf32>
    %281 = vector.broadcast %177 : vector<1x32xf32> to vector<16x32xf32>
    %282 = arith.mulf %280, %281 : vector<16x32xf32>
    %283 = vector.broadcast %178 : vector<1x32xf32> to vector<16x32xf32>
    %284 = arith.addf %282, %283 : vector<16x32xf32>
    %285 = arith.truncf %284 : vector<16x32xf32> to vector<16x32xbf16>
    %cst_89 = arith.constant dense<0.000000e+00> : vector<16x64xf32>
    %286 = tpu.matmul %285, %170, %cst_89 {dimension_numbers = #tpu.dot_dimension_numbers<[1], [0], [0], [1], [0, 0, 1, 1], [], []>} : vector<16x32xbf16>, vector<32x64xbf16>, vector<16x64xf32> -> vector<16x64xf32>
    %287 = vector.broadcast %179 : vector<1x64xf32> to vector<16x64xf32>
    %288 = arith.addf %286, %287 : vector<16x64xf32>
    %cst_90 = arith.constant 5.000000e-01 : f32
    %289 = vector.broadcast %cst_90 : f32 to vector<16x64xf32>
    %290 = arith.mulf %289, %288 : vector<16x64xf32>
    %cst_91 = arith.constant 0.707106769 : f32
    %291 = vector.broadcast %cst_91 : f32 to vector<16x64xf32>
    %292 = arith.mulf %288, %291 : vector<16x64xf32>
    %293 = math.erf %292 : vector<16x64xf32>
    %cst_92 = arith.constant 1.000000e+00 : f32
    %294 = vector.broadcast %cst_92 : f32 to vector<16x64xf32>
    %295 = arith.addf %294, %293 : vector<16x64xf32>
    %296 = arith.mulf %290, %295 : vector<16x64xf32>
    %297 = arith.truncf %296 : vector<16x64xf32> to vector<16x64xbf16>
    %cst_93 = arith.constant dense<0.000000e+00> : vector<16x32xf32>
    %298 = tpu.matmul %297, %172, %cst_93 {dimension_numbers = #tpu.dot_dimension_numbers<[1], [0], [0], [1], [0, 0, 1, 1], [], []>} : vector<16x64xbf16>, vector<64x32xbf16>, vector<16x32xf32> -> vector<16x32xf32>
    %299 = vector.broadcast %180 : vector<1x32xf32> to vector<16x32xf32>
    %300 = arith.addf %298, %299 : vector<16x32xf32>
    %301 = arith.addf %300, %284 : vector<16x32xf32>
    %cst_94 = arith.constant dense<0.000000e+00> : vector<16xf32>
    %302 = vector.multi_reduction <add>, %301, %cst_94 [1] : vector<16x32xf32> to vector<16xf32>
    %303 = vector.shape_cast %302 : vector<16xf32> to vector<16x1xf32>
    %cst_95 = arith.constant 3.200000e+01 : f32
    %304 = vector.broadcast %cst_95 : f32 to vector<16x1xf32>
    %305 = arith.divf %303, %304 : vector<16x1xf32>
    %306 = vector.broadcast %305 : vector<16x1xf32> to vector<16x32xf32>
    %307 = arith.subf %301, %306 : vector<16x32xf32>
    %308 = arith.mulf %307, %307 : vector<16x32xf32>
    %cst_96 = arith.constant dense<0.000000e+00> : vector<16xf32>
    %309 = vector.multi_reduction <add>, %308, %cst_96 [1] : vector<16x32xf32> to vector<16xf32>
    %310 = vector.shape_cast %309 : vector<16xf32> to vector<16x1xf32>
    %cst_97 = arith.constant 3.200000e+01 : f32
    %311 = vector.broadcast %cst_97 : f32 to vector<16x1xf32>
    %312 = arith.divf %310, %311 : vector<16x1xf32>
    %cst_98 = arith.constant 9.99999974E-6 : f32
    %313 = vector.broadcast %cst_98 : f32 to vector<16x1xf32>
    %314 = arith.addf %312, %313 : vector<16x1xf32>
    %315 = math.rsqrt %314 : vector<16x1xf32>
    %316 = vector.broadcast %315 : vector<16x1xf32> to vector<16x32xf32>
    %317 = arith.mulf %307, %316 : vector<16x32xf32>
    %318 = vector.broadcast %181 : vector<1x32xf32> to vector<16x32xf32>
    %319 = arith.mulf %317, %318 : vector<16x32xf32>
    %320 = vector.broadcast %182 : vector<1x32xf32> to vector<16x32xf32>
    %321 = arith.addf %319, %320 : vector<16x32xf32>
    %322 = arith.addf %162, %321 : vector<16x32xf32>
    %cst_99 = arith.constant 5.000000e-01 : f32
    %323 = vector.broadcast %cst_99 : f32 to vector<16x32xf32>
    %324 = arith.mulf %322, %323 : vector<16x32xf32>
    %c0_100 = arith.constant 0 : index
    %c0_101 = arith.constant 0 : index
    %325 = vector.load %arg5[%c0_100, %c0_101] : memref<16x32xf32, #tpu.memory_space<vmem>>, vector<16x32xf32>
    tpu.vector_store %arg5[%c0_100, %c0_101], %324 {strides = array<i32>} : memref<16x32xf32, #tpu.memory_space<vmem>>, vector<16x32xf32>,
    return
  }
}

</mosaic_0001>

<bundles_post_ra>
// kernel: hsum_forward.1
= control target key start
LH: loop header
LB: loop body
LE: loop exit
PB: predicated region body
PF: predicated region fallthrough
CT: control target
= control target key end

     0   :  { %v3158_v1 = vmov 0.0   ;;  %vm3159_vm0 = vmmov 0   ;;  %vm59_vm1 = vcmask 261120   ;;  %s3690_s0 = inlined_call_operand.vmem [shape: f32[2,16,32], index: 0, kind: input, shape index: {}]   ;;  %s3691_s1 = inlined_call_operand.vmem [shape: f32[16,16], index: 1, kind: input, shape index: {}]   ;;  %s3692_s2 = inlined_call_operand.vmem [shape: bf16[2,32,192], index: 2, kind: input, shape index: {}]   ;;  %s3693_s3 = inlined_call_operand.vmem [shape: bf16[2,64,32], index: 3, kind: input, shape index: {}]   ;;  %s3694_s4 = inlined_call_operand.vmem [shape: f32[2,8,96], index: 4, kind: input, shape index: {}]   ;;  %s3695_s5 = inlined_call_operand.hbm [shape: f32[16,32], index: 5, kind: output, shape index: {}]  }
   0x1   :  { %v3210_v0 = vld [vmem:[%s3692_s2] ss:$8 sps:$4 sm:$0xff]   ;;  %2631 = vmatprep.subr.bf16.mxu1 %v3158_v1  ;;  %2635 = vmatprep.mubr.msk.bf16.mxu1 %vm3159_vm0, %v3158_v1  ;;  %v3219_v2 = vld [vmem:[%s3692_s2 + $0x10] ss:$8 sps:$4 sm:$0xff]  }
   0x2   :  { %2632 = vmatpush3.bf16.msra.mxu1 %v3210_v0  ;;  %v3224_v3 = vld [vmem:[%s3690_s0 + $0x10] sm:$0xff]  ;;  %v3230_v4 = vld [vmem:[%s3690_s0 + $0x18] sm:$0xff] }
   0x3   :  { %2633 = vmatprep.subr.bf16.mxu1 %v3158_v1  ;;  %v42_v5 = vpack.c.bf16 %v3230_v4, %v3224_v3 }
   0x6   :  { %2634 = vmatpush3.bf16.msra.mxu1 %v3219_v2 }
   0x9   :  { %2636 = vmatmul.mubr.msk.bf16.vlgmr.msra.gmra.mrb[0].mxu1 %vm59_vm1, %v42_v5 }
   0xa   :  { %10 = vsyncpa [#allocation3], 0  ;;  %v43_v6 = vlaneseq  ;;  %v3242_v9 = vld [vmem:[%s3694_s4] sm:$0xff]  ;;  %vm110_vm2 = vcmask 64512   ;;  %s3160_s28 = smov 120   ;;  %s3161_s29 = smov 80  }
   0xb   :  { %s3162_s30 = smov 96   ;;  %s3163_s6 = smov 112   ;;  %vm3274_vm3 = vmpackc.low %vm110_vm2, %vm110_vm2  ;;  %v3298_v36 = vld [vmem:[%s3691_s1 + $0x8] sm:$0xff]  ;;  %v3303_v39 = vld [vmem:[%s3691_s1] sm:$0xff]  ;;  %vm198_vm4 = vcmask 130048   ;;  %vm948_vm5 = vcmask 195584  }
   0xc   :  { %v3236_v7 = vshrl.u32 %v43_v6, 7  ;;  %s3164_s7 = smov 88   ;;  %s3165_s12 = smov 56   ;;  %vm1143_vm6 = vcmask 523264  }
   0xd   :  { %s3166_s13 = smov 64   ;;  %s3167_s14 = smov 48  }
   0xe   :  { %v45_v8 = vsub.s32 0, %v3236_v7  ;;  %s3168_s15 = smov 72   ;;  %s3169_s16 = smov 104  }
   0xf   :  { %s3170_s21 = smov 32   ;;  %s3171_s22 = smov 8  }
  0x10   :  { %v46_v10 = vrot.slane %v3242_v9, %v45_v8  ;;  %s3172_s23 = smov 40   ;;  %s3173_s24 = smov 16  }
  0x11   :  { %s3174_s25 = smov 24  }
  0xdc   :  { %v97_v11 = vpop.f32.mrb[0].mxu1 }
  0xdd   :  { %v3247_v12 = vadd.f32 %v97_v11, %v46_v10  ;;  %v2637_v13 = vpop.f32.mrb[1].mxu1 }
  0xde   :  { %v100_v14 = vpop.f32.mrb[2].mxu1 }
  0xdf   :  { %v3249_v15 = vadd.f32 %v100_v14, %v46_v10  ;;  %308 = vrot.lane.b32.xlu1 %v3247_v12, %s3160_s28  ;;  %v2638_v16 = vpop.f32.mrb[3].mxu1  ;;  %2643 = vmatprep.mubr.msk.f32.mxu1 %vm110_vm2, %v3247_v12 }
  0xe1   :  { %v3257_v17 = vpack.i.bf16 %v3249_v15, %v3247_v12 }
  0xe3   :  { %2925 = vrot.lane.b32.xlu1 %v3257_v17, %s3161_s29  ;;  %2915 = vrot.lane.b32.xlu0 %v3257_v17, %s3162_s30 }
  0xe7   :  { %512 = vrot.lane.b32.xlu1 %v3247_v12, %s3163_s6  ;;  %2920 = vrot.lane.b32.xlu0 %v3257_v17, %s3164_s7 }
  0xeb   :  { %310 = vrot.lane.b32.xlu0 %v3249_v15, %s3160_s28 }
  0xef   :  { %514 = vrot.lane.b32.xlu0 %v3249_v15, %s3163_s6 }
 0x151   :  { %v309_v18 = vpop.permute.xlu1 %308 }
 0x152   :  { %2657 = vmatprep.mubr.msk.f32.mxu0 %vm110_vm2, %v309_v18 }
 0x155   :  { %v2916_v19 = vpop.permute.xlu0 %2915  ;;  %v2926_v22 = vpop.permute.xlu1 %2925 }
 0x156   :  { %v2918_v20 = vunpack.i.h.bf16 %v2916_v19  ;;  %v2917_v21 = vunpack.i.l.bf16 %v2916_v19  ;;  %v2928_v26 = vunpack.i.h.bf16 %v2926_v22  ;;  %v2927_v27 = vunpack.i.l.bf16 %v2926_v22 }
 0x158   :  { %v2815_v24 = vpack.c.bf16 %v2918_v20, %v2917_v21  ;;  %v2835_v31 = vpack.c.bf16 %v2928_v26, %v2927_v27 }
 0x159   :  { %v2921_v25 = vpop.permute.xlu0 %2920  ;;  %v513_v33 = vpop.permute.xlu1 %512 }
 0x15a   :  { %v2923_v28 = vunpack.i.h.bf16 %v2921_v25  ;;  %v2922_v29 = vunpack.i.l.bf16 %v2921_v25  ;;  %2817 = vmatprep.subr.msk.bf16.mxu1 %vm3274_vm3, %v2815_v24 }
 0x15b   :  { %2820 = vmatpush3.bf16.xpose.msk.msra.mxu1 %vm3274_vm3, %v2815_v24 }
 0x15c   :  { %v2825_v30 = vpack.c.bf16 %v2923_v28, %v2922_v29 }
 0x15d   :  { %v311_v32 = vpop.permute.xlu0 %310 }
 0x15e   :  { %2827 = vmatprep.subr.msk.bf16.mxu0 %vm3274_vm3, %v2825_v30 }
 0x15f   :  { %2830 = vmatpush3.bf16.xpose.msk.msra.mxu0 %vm3274_vm3, %v2825_v30 }
 0x160   :  { %2837 = vmatprep.subr.msk.bf16.mxu0 %vm3274_vm3, %v2835_v31 }
 0x161   :  { %v515_v34 = vpop.permute.xlu0 %514 }
 0x162   :  { %2644 = vmatmul.mubr.msk.f32.vlgmr.msra.gmra.mrb[4].mxu1 %vm110_vm2, %v3249_v15 }
 0x166   :  { %2658 = vmatmul.mubr.msk.f32.vlgmr.msra.gmra.mrb[0].mxu0 %vm110_vm2, %v311_v32 }
 0x167   :  { %2840 = vmatpush3.bf16.xpose.msk.msra.mxu0 %vm3274_vm3, %v2835_v31  ;;  %2671 = vmatprep.mubr.msk.f32.mxu0 %vm110_vm2, %v513_v33 }
 0x16e   :  { %2672 = vmatmul.mubr.msk.f32.vlgmr.msra.gmra.mrb[2].mxu0 %vm110_vm2, %v515_v34 }
 0x235   :  { %v2645_v35 = vpop.f32.mrb[4].mxu1 }
 0x236   :  { %v195_v37 = vmul.f32 0.35355338, %v2645_v35  ;;  %v185_v38 = vpop.f32.mrb[5].mxu1 }
 0x237   :  { %v194_v40 = vmul.f32 0.35355338, %v185_v38 }
 0x238   :  { %v197_v41 = vadd.f32 %v195_v37, %v3298_v36 }
 0x239   :  { %v2659_v42 = vpop.f32.mrb[0].mxu0  ;;  %v196_v43 = vadd.f32 %v194_v40, %v3303_v39 }
 0x23a   :  { %v400_v44 = vmul.f32 0.35355338, %v2659_v42  ;;  %v390_v45 = vpop.f32.mrb[1].mxu0  ;;  %v202_v46 = vsel %vm198_vm4, %v197_v41, -inf }
 0x23b   :  { %v399_v47 = vmul.f32 0.35355338, %v390_v45  ;;  %203 = vmax.xlane.f32.xlu0 %v202_v46  ;;  %v199_v48 = vsel %vm198_vm4, %v196_v43, -inf }
 0x23c   :  { %200 = vmax.xlane.f32.xlu1 %v199_v48  ;;  %v402_v49 = vadd.f32 %v400_v44, %v3298_v36 }
 0x23d   :  { %v401_v50 = vadd.f32 %v399_v47, %v3303_v39 }
 0x23e   :  { %v406_v51 = vsel %vm198_vm4, %v402_v49, -inf }
 0x23f   :  { %v403_v52 = vsel %vm198_vm4, %v401_v50, -inf }
 0x240   :  { %404 = vmax.xlane.f32.xlu0 %v403_v52  ;;  %407 = vmax.xlane.f32.xlu1 %v406_v51 }
 0x241   :  { %v2673_v53 = vpop.f32.mrb[2].mxu0 }
 0x242   :  { %v604_v54 = vmul.f32 0.35355338, %v2673_v53  ;;  %v594_v55 = vpop.f32.mrb[3].mxu0 }
 0x243   :  { %v603_v56 = vmul.f32 0.35355338, %v594_v55 }
 0x244   :  { %v3314_v57 = vadd.f32 %v604_v54, %v3298_v36 }
 0x245   :  { %v605_v58 = vadd.f32 %v603_v56, %v3303_v39 }
 0x246   :  { %v610_v59 = vsel %vm198_vm4, %v3314_v57, -inf }
 0x247   :  { %611 = vmax.xlane.f32.xlu1 %v610_v59  ;;  %v607_v60 = vsel %vm198_vm4, %v605_v58, -inf }
 0x248   :  { %608 = vmax.xlane.f32.xlu0 %v607_v60 }
 0x258   :  { %2935 = vrot.lane.b32.xlu1 %v3257_v17, %s3165_s12 }
 0x25e   :  { %2930 = vrot.lane.b32.xlu0 %v3257_v17, %s3166_s13 }
 0x2c8   :  { %v204_v61 = vpop.xlane.xlu0 %203 }
 0x2c9   :  { %v206_v62 = vsub.f32 %v197_v41, %v204_v61  ;;  %v201_v63 = vpop.xlane.xlu1 %200 }
 0x2ca   :  { %v205_v5 = vsub.f32 %v196_v43, %v201_v63 }
 0x2cb   :  { %v209_v6 = vmul.f32 1.442695, %v206_v62 }
 0x2cc   :  { %v207_v10 = vmul.f32 1.442695, %v205_v5 }
 0x2cd   :  { %3044 = vpow2.f32 %v209_v6  ;;  %v405_v11 = vpop.xlane.xlu0 %404  ;;  %v408_v13 = vpop.xlane.xlu1 %407 }
 0x2ce   :  { %3046 = vpow2.f32 %v207_v10  ;;  %v409_v14 = vsub.f32 %v401_v50, %v405_v11  ;;  %v410_v16 = vsub.f32 %v402_v49, %v408_v13 }
 0x2d0   :  { %v411_v18 = vmul.f32 1.442695, %v409_v14  ;;  %v413_v19 = vmul.f32 1.442695, %v410_v16 }
 0x2d2   :  { %3048 = vpow2.f32 %v411_v18 }
 0x2d3   :  { %3050 = vpow2.f32 %v413_v19 }
 0x2d4   :  { %v612_v20 = vpop.xlane.xlu1 %611 }
 0x2d5   :  { %v609_v21 = vpop.xlane.xlu0 %608  ;;  %v614_v45 = vsub.f32 %v3314_v57, %v612_v20 }
 0x2d6   :  { %v613_v22 = vsub.f32 %v605_v58, %v609_v21  ;;  %v3026_v21 = vld [vmem:[%s3692_s2 + $0x4] ss:$8 sps:$4 sm:$0xff]  }
 0x2d7   :  { %v3045_v24 = vpop.eup %3044  ;;  %v617_v46 = vmul.f32 1.442695, %v614_v45 }
 0x2d8   :  { %v3047_v25 = vpop.eup %3046  ;;  %v615_v26 = vmul.f32 1.442695, %v613_v22  ;;  %v2936_v27 = vpop.permute.xlu1 %2935  ;;  %v214_v28 = vsel %vm198_vm4, %v3045_v24, 0.0 }
 0x2d9   :  { %v2938_v29 = vunpack.i.h.bf16 %v2936_v27  ;;  %v2931_v30 = vpop.permute.xlu0 %2930  ;;  %215 = vadd.xlane.f32.xlu1 %v214_v28  ;;  %v211_v31 = vsel %vm198_vm4, %v3047_v25, 0.0  ;;  %v2937_v32 = vunpack.i.l.bf16 %v2936_v27 }
 0x2da   :  { %3052 = vpow2.f32 %v615_v26  ;;  %v2933_v33 = vunpack.i.h.bf16 %v2931_v30  ;;  %v2932_v34 = vunpack.i.l.bf16 %v2931_v30  ;;  %212 = vadd.xlane.f32.xlu0 %v211_v31 }
 0x2db   :  { %v2831_v41 = vpack.c.bf16 %v2938_v29, %v2937_v32  ;;  %3054 = vpow2.f32 %v617_v46 }
 0x2dc   :  { %v3049_v35 = vpop.eup %3048  ;;  %v2821_v37 = vpack.c.bf16 %v2933_v33, %v2932_v34 }
 0x2dd   :  { %v3051_v38 = vpop.eup %3050  ;;  %v415_v40 = vsel %vm198_vm4, %v3049_v35, 0.0 }
 0x2de   :  { %2822 = vmatprep.subr.bf16.mxu1 %v2821_v37  ;;  %416 = vadd.xlane.f32.xlu0 %v415_v40  ;;  %v418_v42 = vsel %vm198_vm4, %v3051_v38, 0.0 }
 0x2df   :  { %419 = vadd.xlane.f32.xlu1 %v418_v42  ;;  %2824 = vmatpush3.bf16.msra.mxu1 %v2821_v37 }
 0x2e0   :  { %2832 = vmatprep.subr.bf16.mxu1 %v2831_v41 }
 0x2e4   :  { %v3053_v43 = vpop.eup %3052 }
 0x2e5   :  { %v619_v44 = vsel %vm198_vm4, %v3053_v43, 0.0  ;;  %v3055_v47 = vpop.eup %3054 }
 0x2e6   :  { %620 = vadd.xlane.f32.xlu0 %v619_v44  ;;  %v622_v48 = vsel %vm198_vm4, %v3055_v47, 0.0 }
 0x2f0   :  { %2940 = vrot.lane.b32.xlu1 %v3257_v17, %s3167_s14 }
 0x2fc   :  { %2945 = vrot.lane.b32.xlu0 %v3257_v17, %s3168_s15 }
 0x300   :  { %718 = vrot.lane.b32.xlu0 %v3249_v15, %s3169_s16 }
 0x314   :  { %623 = vadd.xlane.f32.xlu1 %v622_v48 }
 0x325   :  { %716 = vrot.lane.b32.xlu1 %v3247_v12, %s3169_s16 }
 0x366   :  { %v216_v49 = vpop.xlane.xlu1 %215 }
 0x367   :  { %3056 = vrcp.f32 %v216_v49  ;;  %v213_v50 = vpop.xlane.xlu0 %212 }
 0x368   :  { %3058 = vrcp.f32 %v213_v50 }
 0x36b   :  { %v417_v51 = vpop.xlane.xlu0 %416 }
 0x36c   :  { %3060 = vrcp.f32 %v417_v51  ;;  %v420_v52 = vpop.xlane.xlu1 %419 }
 0x36d   :  { %3062 = vrcp.f32 %v420_v52 }
 0x370   :  { %v2941_v53 = vpop.permute.xlu1 %2940 }
 0x371   :  { %v3057_v54 = vpop.eup %3056  ;;  %v2943_v55 = vunpack.i.h.bf16 %v2941_v53  ;;  %v2942_v56 = vunpack.i.l.bf16 %v2941_v53 }
 0x372   :  { %v3059_v15 = vpop.eup %3058  ;;  %v220_v59 = vmul.f32 %v3057_v54, %v3045_v24  ;;  %v3029_v24 = vld [vmem:[%s3692_s2 + $0x14] ss:$8 sps:$4 sm:$0xff]  }
 0x373   :  { %v621_v57 = vpop.xlane.xlu0 %620  ;;  %v219_v58 = vmul.f32 %v3059_v15, %v3047_v25  ;;  %v2841_v60 = vpack.c.bf16 %v2943_v55, %v2942_v56 }
 0x374   :  { %3064 = vrcp.f32 %v621_v57 }
 0x375   :  { %2650 = vmatprep.mubr.msk.f32.mxu1 %vm198_vm4, %v219_v58 }
 0x376   :  { %v3061_v12 = vpop.eup %3060  ;;  %2651 = vmatmul.mubr.msk.f32.vlgmr.msra.gmra.mrb[6].mxu1 %vm198_vm4, %v220_v59 }
 0x377   :  { %v3063_v61 = vpop.eup %3062  ;;  %2834 = vmatpush3.bf16.msra.mxu1 %v2831_v41  ;;  %v2946_v62 = vpop.permute.xlu0 %2945  ;;  %v423_v63 = vmul.f32 %v3061_v12, %v3049_v35 }
 0x378   :  { %v424_v5 = vmul.f32 %v3063_v61, %v3051_v38  ;;  %v2948_v6 = vunpack.i.h.bf16 %v2946_v62  ;;  %v2947_v10 = vunpack.i.l.bf16 %v2946_v62  ;;  %2842 = vmatprep.subr.bf16.mxu1 %v2841_v60 }
 0x379   :  { %2664 = vmatprep.mubr.msk.f32.mxu1 %vm198_vm4, %v423_v63 }
 0x37a   :  { %v2845_v11 = vpack.c.bf16 %v2948_v6, %v2947_v10  ;;  %2665 = vmatmul.mubr.msk.f32.vlgmr.msra.gmra.mrb[8].mxu1 %vm198_vm4, %v424_v5 }
 0x37b   :  { %2844 = vmatpush3.bf16.msra.mxu1 %v2841_v60  ;;  %v719_v22 = vpop.permute.xlu0 %718 }
 0x37c   :  { %2847 = vmatprep.subr.msk.bf16.mxu1 %vm3274_vm3, %v2845_v11 }
 0x37e   :  { %v3065_v13 = vpop.eup %3064 }
 0x37f   :  { %v627_v14 = vmul.f32 %v3065_v13, %v3053_v43 }
 0x381   :  { %2678 = vmatprep.mubr.msk.f32.mxu1 %vm198_vm4, %v627_v14 }
 0x3a1   :  { %v624_v16 = vpop.xlane.xlu1 %623 }
 0x3a2   :  { %3066 = vrcp.f32 %v624_v16 }
 0x3a5   :  { %v717_v20 = vpop.permute.xlu1 %716 }
 0x3ac   :  { %v3067_v18 = vpop.eup %3066 }
 0x3ad   :  { %v628_v19 = vmul.f32 %v3067_v18, %v3055_v47 }
 0x3af   :  { %2679 = vmatmul.mubr.msk.f32.vlgmr.msra.gmra.mrb[10].mxu1 %vm198_vm4, %v628_v19 }
 0x3b0   :  { %2850 = vmatpush3.bf16.xpose.msk.msra.mxu1 %vm3274_vm3, %v2845_v11  ;;  %2685 = vmatprep.mubr.msk.f32.mxu1 %vm110_vm2, %v717_v20 }
 0x3b1   :  { %2703 = vmatprep.subr.bf16.mxu1 %v3158_v1 }
 0x3b7   :  { %2686 = vmatmul.mubr.msk.f32.vlgmr.msra.gmra.mrb[12].mxu1 %vm110_vm2, %v719_v22 }
 0x3b8   :  { %2704 = vmatpush3.bf16.msra.mxu1 %v3026_v21  ;;  %2707 = vmatprep.mubr.msk.bf16.mxu1 %vm3159_vm0, %v3158_v1 }
 0x3b9   :  { %2705 = vmatprep.subr.bf16.mxu1 %v3158_v1 }
 0x3bc   :  { %2706 = vmatpush3.bf16.msra.mxu1 %v3029_v24 }
 0x3bd   :  { %2723 = vmatprep.subr.bf16.mxu1 %v3158_v1 }
 0x449   :  { %v3362_v25 = vpop.f32.mrb[6].mxu1 }
 0x44a   :  { %v3364_v26 = vpop.f32.mrb[7].mxu1 }
 0x44d   :  { %v2666_v27 = vpop.f32.mrb[8].mxu1 }
 0x44e   :  { %v503_v28 = vpop.f32.mrb[9].mxu1 }
 0x44f   :  { %v2954_v29 = vpack.i.bf16 %v2666_v27, %v503_v28 }
 0x482   :  { %v2680_v30 = vpop.f32.mrb[10].mxu1 }
 0x483   :  { %v707_v31 = vpop.f32.mrb[11].mxu1 }
 0x484   :  { %v2959_v32 = vpack.i.bf16 %v2680_v30, %v707_v31 }
 0x48a   :  { %v2687_v33 = vpop.f32.mrb[12].mxu1 }
 0x48b   :  { %v808_v34 = vmul.f32 0.35355338, %v2687_v33  ;;  %v798_v35 = vpop.f32.mrb[13].mxu1 }
 0x48c   :  { %v807_v37 = vmul.f32 0.35355338, %v798_v35 }
 0x48d   :  { %v810_v38 = vadd.f32 %v808_v34, %v3298_v36 }
 0x48e   :  { %v809_v40 = vadd.f32 %v807_v37, %v3303_v39 }
 0x48f   :  { %v814_v41 = vsel %vm198_vm4, %v810_v38, -inf }
 0x490   :  { %815 = vmax.xlane.f32.xlu0 %v814_v41  ;;  %v811_v42 = vsel %vm198_vm4, %v809_v40, -inf }
 0x491   :  { %812 = vmax.xlane.f32.xlu1 %v811_v42 }
 0x51d   :  { %v816_v43 = vpop.xlane.xlu0 %815 }
 0x51e   :  { %v818_v44 = vsub.f32 %v810_v38, %v816_v43  ;;  %v813_v45 = vpop.xlane.xlu1 %812 }
 0x51f   :  { %v817_v46 = vsub.f32 %v809_v40, %v813_v45 }
 0x520   :  { %v821_v47 = vmul.f32 1.442695, %v818_v44 }
 0x521   :  { %v819_v48 = vmul.f32 1.442695, %v817_v46 }
 0x522   :  { %3068 = vpow2.f32 %v821_v47 }
 0x523   :  { %3070 = vpow2.f32 %v819_v48 }
 0x52c   :  { %v3069_v49 = vpop.eup %3068 }
 0x52d   :  { %v3071_v50 = vpop.eup %3070  ;;  %v826_v51 = vsel %vm198_vm4, %v3069_v49, 0.0 }
 0x52e   :  { %827 = vadd.xlane.f32.xlu1 %v826_v51  ;;  %v823_v52 = vsel %vm198_vm4, %v3071_v50, 0.0 }
 0x52f   :  { %824 = vadd.xlane.f32.xlu0 %v823_v52 }
 0x53f   :  { %956 = vrot.lane.b32.xlu1 %v3210_v0, %s3170_s21 }
 0x543   :  { %2955 = vrot.lane.b32.xlu1 %v2954_v29, %s3171_s22 }
 0x545   :  { %2950 = vrot.lane.b32.xlu0 %v3257_v17, %s3172_s23 }
 0x549   :  { %2960 = vrot.lane.b32.xlu0 %v2959_v32, %s3173_s24 }
 0x54d   :  { %958 = vrot.lane.b32.xlu0 %v3219_v2, %s3170_s21 }
 0x5bb   :  { %v828_v53 = vpop.xlane.xlu1 %827 }
 0x5bc   :  { %3072 = vrcp.f32 %v828_v53  ;;  %v825_v54 = vpop.xlane.xlu0 %824 }
 0x5bd   :  { %3074 = vrcp.f32 %v825_v54 }
 0x5bf   :  { %v957_v12 = vpop.permute.xlu1 %956 }
 0x5c0   :  { %v2951_v15 = vpop.permute.xlu0 %2950 }
 0x5c1   :  { %v2953_v55 = vunpack.i.h.bf16 %v2951_v15  ;;  %v2952_v0 = vunpack.i.l.bf16 %v2951_v15  ;;  %v1037_v15 = vsub.s32 2, %v3236_v7 }
 0x5c3   :  { %v2851_v56 = vpack.c.bf16 %v2953_v55, %v2952_v0  ;;  %v2956_v5 = vpop.permute.xlu1 %2955  ;;  %v1038_v55 = vrot.slane %v3242_v9, %v1037_v15  ;;  %v1043_v0 = vsub.s32 3, %v3236_v7 }
 0x5c4   :  { %v2961_v2 = vpop.permute.xlu0 %2960  ;;  %v2958_v6 = vunpack.i.h.bf16 %v2956_v5  ;;  %v2957_v10 = vunpack.i.l.bf16 %v2956_v5  ;;  %v3031_v5 = vld [vmem:[%s3693_s3 + $0x8] sm:$0xff]  }
 0x5c5   :  { %2852 = vmatprep.subr.bf16.mxu0 %v2851_v56  ;;  %v2963_v11 = vunpack.i.h.bf16 %v2961_v2  ;;  %v2962_v13 = vunpack.i.l.bf16 %v2961_v2 }
 0x5c6   :  { %v3073_v57 = vpop.eup %3072  ;;  %2854 = vmatpush3.bf16.msra.mxu0 %v2851_v56  ;;  %v945_v14 = vsel %vm110_vm2, %v3362_v25, %v2958_v6  ;;  %v944_v16 = vsel %vm110_vm2, %v3364_v26, %v2957_v10  ;;  %v954_v25 = vsub.s32 1, %v3236_v7  ;;  %v3032_v6 = vld [vmem:[%s3693_s3 + $0x10] sm:$0xff]   ;;  %v3033_v10 = vld [vmem:[%s3693_s3 + $0x18] sm:$0xff]  }
 0x5c7   :  { %v3075_v58 = vpop.eup %3074  ;;  %2695 = vmatprep.subr.bf16.mxu0 %v3158_v1  ;;  %v832_v59 = vmul.f32 %v3073_v57, %v3069_v49  ;;  %v946_v21 = vsel %vm198_vm4, %v944_v16, %v2962_v13  ;;  %v947_v22 = vsel %vm198_vm4, %v945_v14, %v2963_v11  ;;  %v1050_v11 = vsub.s32 4, %v3236_v7 }
 0x5c8   :  { %v831_v17 = vmul.f32 %v3075_v58, %v3071_v50  ;;  %v959_v60 = vpop.permute.xlu0 %958  ;;  %v955_v26 = vrot.slane %v3242_v9, %v954_v25 }
 0x5c9   :  { %v1051_v13 = vrot.slane %v3242_v9, %v1050_v11 }
 0x5ca   :  { %2692 = vmatprep.mubr.msk.f32.mxu0 %vm198_vm4, %v831_v17 }
 0x5cb   :  { %2693 = vmatmul.mubr.msk.f32.vlgmr.msra.gmra.mrb[4].mxu0 %vm198_vm4, %v832_v59 }
 0x5cc   :  { %2696 = vmatpush3.bf16.msra.mxu0 %v957_v12  ;;  %2699 = vmatprep.mubr.msk.bf16.mxu0 %vm3159_vm0, %v3158_v1  ;;  %v1044_v12 = vrot.slane %v3242_v9, %v1043_v0 }
 0x5cd   :  { %2697 = vmatprep.subr.bf16.mxu0 %v3158_v1 }
 0x5d0   :  { %2698 = vmatpush3.bf16.msra.mxu0 %v959_v60 }
 0x5d1   :  { %2711 = vmatprep.subr.bf16.mxu0 %v3158_v1 }
 0x69e   :  { %v2694_v61 = vpop.f32.mrb[4].mxu0 }
 0x69f   :  { %v911_v62 = vpop.f32.mrb[5].mxu0 }
 0x6a0   :  { %v2964_v63 = vpack.i.bf16 %v2694_v61, %v911_v62 }
 0x6a2   :  { %2965 = vrot.lane.b32.xlu1 %v2964_v63, %s3174_s25  ;;  %v3030_v63 = vld [vmem:[%s3693_s3] sm:$0xff]  }
 0x714   :  { %v2966_v18 = vpop.permute.xlu1 %2965 }
 0x715   :  { %v2968_v19 = vunpack.i.h.bf16 %v2966_v18  ;;  %v2967_v20 = vunpack.i.l.bf16 %v2966_v18 }
 0x717   :  { %v949_v24 = vsel %vm948_vm5, %v946_v21, %v2967_v20  ;;  %v950_v27 = vsel %vm948_vm5, %v947_v22, %v2968_v19 }
 0x718   :  { %v951_v28 = vpack.c.bf16 %v950_v27, %v949_v24 }
 0x71a   :  { %2700 = vmatmul.mubr.msk.bf16.vlgmr.msra.gmra.mrb[8].mxu0 %vm59_vm1, %v951_v28 }
 0x71b   :  { %2719 = vmatprep.mubr.msk.bf16.mxu0 %vm3159_vm0, %v3158_v1  ;;  %2712 = vmatpush3.bf16.msra.mxu0 %v3030_v63  ;;  %v1224_v63 = vsub.s32 7, %v3236_v7 }
 0x71c   :  { %2713 = vmatprep.subr.bf16.mxu0 %v3158_v1 }
 0x71f   :  { %2714 = vmatpush3.bf16.msra.mxu0 %v3031_v5 }
 0x720   :  { %2715 = vmatprep.subr.bf16.mxu0 %v3158_v1 }
 0x723   :  { %2716 = vmatpush3.bf16.msra.mxu0 %v3032_v6 }
 0x724   :  { %2717 = vmatprep.subr.bf16.mxu0 %v3158_v1 }
 0x727   :  { %2718 = vmatpush3.bf16.msra.mxu0 %v3033_v10 }
 0x7ed   :  { %v999_v29 = vpop.f32.mrb[8].mxu0 }
 0x7ee   :  { %v1000_v30 = vadd.f32 %v999_v29, %v955_v26  ;;  %v2701_v31 = vpop.f32.mrb[9].mxu0 }
 0x7ef   :  { %v1002_v32 = vpop.f32.mrb[10].mxu0 }
 0x7f0   :  { %v1003_v33 = vadd.f32 %v1002_v32, %v955_v26  ;;  %v2702_v34 = vpop.f32.mrb[11].mxu0  ;;  %v1006_v35 = vadd.f32 %v3224_v3, %v1000_v30 }
 0x7f2   :  { %v1008_v37 = vsel %vm59_vm1, %v1006_v35, 0.0  ;;  %v1007_v38 = vadd.f32 %v3230_v4, %v1003_v33 }
 0x7f3   :  { %1009 = vadd.xlane.f32.xlu1 %v1008_v37 }
 0x7f4   :  { %v1011_v40 = vsel %vm59_vm1, %v1007_v38, 0.0 }
 0x7f5   :  { %1012 = vadd.xlane.f32.xlu0 %v1011_v40 }
 0x880   :  { %v1010_v41 = vpop.xlane.xlu1 %1009 }
 0x881   :  { %v1015_v42 = vmul.f32 0.03125, %v1010_v41 }
 0x882   :  { %v1013_v43 = vpop.xlane.xlu0 %1012 }
 0x883   :  { %v1017_v44 = vsub.f32 %v1006_v35, %v1015_v42  ;;  %v1016_v45 = vmul.f32 0.03125, %v1013_v43  ;;  %v1117_v35 = vsub.s32 5, %v3236_v7 }
 0x885   :  { %v1018_v46 = vsub.f32 %v1007_v38, %v1016_v45  ;;  %v1019_v47 = vmul.f32 %v1017_v44, %v1017_v44  ;;  %v1118_v37 = vrot.slane %v3242_v9, %v1117_v35 }
 0x887   :  { %v1021_v48 = vsel %vm59_vm1, %v1019_v47, 0.0  ;;  %v1020_v49 = vmul.f32 %v1018_v46, %v1018_v46 }
 0x888   :  { %1022 = vadd.xlane.f32.xlu0 %v1021_v48 }
 0x889   :  { %v1024_v3 = vsel %vm59_vm1, %v1020_v49, 0.0 }
 0x88a   :  { %1025 = vadd.xlane.f32.xlu1 %v1024_v3 }
 0x915   :  { %v1023_v50 = vpop.xlane.xlu0 %1022 }
 0x916   :  { %v1027_v4 = vmul.f32 0.03125, %v1023_v50 }
 0x917   :  { %v1026_v51 = vpop.xlane.xlu1 %1025 }
 0x918   :  { %v1029_v52 = vadd.f32 1e-05, %v1027_v4  ;;  %v1028_v53 = vmul.f32 0.03125, %v1026_v51 }
 0x91a   :  { %3076 = vrsqrt.f32 %v1029_v52  ;;  %v1030_v54 = vadd.f32 1e-05, %v1028_v53 }
 0x91c   :  { %3078 = vrsqrt.f32 %v1030_v54 }
 0x924   :  { %v3077_v56 = vpop.eup %3076 }
 0x925   :  { %v1033_v57 = vmul.f32 %v3077_v56, %v1017_v44 }
 0x926   :  { %v3079_v58 = vpop.eup %3078 }
 0x927   :  { %v1039_v17 = vmul.f32 %v1038_v55, %v1033_v57  ;;  %v1034_v59 = vmul.f32 %v3079_v58, %v1018_v46  ;;  %v3451_v57 = vld [vmem:[%s3692_s2 + $0x20] ss:$8 sps:$4 sm:$0xff]   ;;  %v3457_v58 = vld [vmem:[%s3692_s2 + $0x30] ss:$8 sps:$4 sm:$0xff]  }
 0x929   :  { %v1040_v2 = vmul.f32 %v1038_v55, %v1034_v59  ;;  %v1045_v60 = vadd.f32 %v1044_v12, %v1039_v17 }
 0x92b   :  { %v1046_v61 = vadd.f32 %v1044_v12, %v1040_v2 }
 0x92d   :  { %v1047_v62 = vpack.c.bf16 %v1046_v61, %v1045_v60 }
 0x92f   :  { %2708 = vmatmul.mubr.msk.bf16.vlgmr.msra.gmra.mrb[16].mxu1 %vm59_vm1, %v1047_v62  ;;  %v1218_v62 = vsub.s32 6, %v3236_v7 }
 0x930   :  { %2727 = vmatprep.mubr.msk.bf16.mxu1 %vm3159_vm0, %v3158_v1  ;;  %2724 = vmatpush3.bf16.msra.mxu1 %v3451_v57 }
 0x931   :  { %2725 = vmatprep.subr.bf16.mxu1 %v3158_v1  ;;  %v1219_v5 = vrot.slane %v3242_v9, %v1218_v62 }
 0x934   :  { %2726 = vmatpush3.bf16.msra.mxu1 %v3457_v58 }
 0xa02   :  { %v1097_v14 = vpop.f32.mrb[16].mxu1 }
 0xa03   :  { %v1098_v16 = vadd.f32 %v1097_v14, %v1051_v13  ;;  %v2709_v18 = vpop.f32.mrb[17].mxu1 }
 0xa04   :  { %v1100_v19 = vpop.f32.mrb[18].mxu1 }
 0xa05   :  { %v1106_v20 = vmul.f32 0.70710677, %v1098_v16  ;;  %v1101_v21 = vadd.f32 %v1100_v19, %v1051_v13  ;;  %v2710_v22 = vpop.f32.mrb[19].mxu1  ;;  %v1104_v29 = vmul.f32 0.5, %v1098_v16  ;;  %v1225_v13 = vrot.slane %v3242_v9, %v1224_v63 }
 0xa06   :  { %v1231_v22 = vld [vmem:[%s3690_s0 + $0x8] sm:$0xff] }
 0xa07   :  { %3080 = verf.f32 %v1106_v20  ;;  %v1107_v24 = vmul.f32 0.70710677, %v1101_v21  ;;  %v1105_v30 = vmul.f32 0.5, %v1101_v21  ;;  %v1230_v21 = vld [vmem:[%s3690_s0] sm:$0xff] }
 0xa09   :  { %3082 = verf.f32 %v1107_v24 }
 0xa11   :  { %v3081_v27 = vpop.eup %3080 }
 0xa12   :  { %v1110_v28 = vadd.f32 1.0, %v3081_v27 }
 0xa13   :  { %v3083_v26 = vpop.eup %3082 }
 0xa14   :  { %v1111_v31 = vadd.f32 1.0, %v3083_v26  ;;  %v1112_v32 = vmul.f32 %v1110_v28, %v1104_v29  ;;  %v3491_v26 = vld [vmem:[%s3694_s4 + $0x8] sm:$0xff] }
 0xa15   :  { %v1254_v29 = vrot.slane %v3491_v26, %v45_v8 }
 0xa16   :  { %v1113_v33 = vmul.f32 %v1111_v31, %v1105_v30 }
 0xa18   :  { %v1114_v34 = vpack.c.bf16 %v1113_v33, %v1112_v32 }
 0xa1a   :  { %2720 = vmatmul.mubr.msk.bf16.vlgmr.msra.gmra.mrb[12].mxu0 %vm1143_vm6, %v1114_v34 }
 0xaed   :  { %v1181_v38 = vpop.f32.mrb[12].mxu0 }
 0xaee   :  { %v1182_v40 = vadd.f32 %v1181_v38, %v1118_v37  ;;  %v2721_v41 = vpop.f32.mrb[13].mxu0 }
 0xaef   :  { %v1184_v42 = vpop.f32.mrb[14].mxu0 }
 0xaf0   :  { %v1185_v43 = vadd.f32 %v1184_v42, %v1118_v37  ;;  %v2722_v44 = vpop.f32.mrb[15].mxu0  ;;  %v1188_v45 = vadd.f32 %v1182_v40, %v1045_v60 }
 0xaf2   :  { %v1190_v46 = vsel %vm59_vm1, %v1188_v45, 0.0  ;;  %v1189_v47 = vadd.f32 %v1185_v43, %v1046_v61 }
 0xaf3   :  { %1191 = vadd.xlane.f32.xlu0 %v1190_v46 }
 0xaf4   :  { %v1193_v48 = vsel %vm59_vm1, %v1189_v47, 0.0 }
 0xaf5   :  { %1194 = vadd.xlane.f32.xlu1 %v1193_v48 }
 0xb80   :  { %v1192_v49 = vpop.xlane.xlu0 %1191 }
 0xb81   :  { %v1196_v3 = vmul.f32 0.03125, %v1192_v49 }
 0xb82   :  { %v1195_v50 = vpop.xlane.xlu1 %1194 }
 0xb83   :  { %v1198_v4 = vsub.f32 %v1188_v45, %v1196_v3  ;;  %v1197_v51 = vmul.f32 0.03125, %v1195_v50 }
 0xb85   :  { %v1199_v52 = vsub.f32 %v1189_v47, %v1197_v51  ;;  %v1200_v53 = vmul.f32 %v1198_v4, %v1198_v4 }
 0xb87   :  { %v1202_v54 = vsel %vm59_vm1, %v1200_v53, 0.0  ;;  %v1201_v55 = vmul.f32 %v1199_v52, %v1199_v52 }
 0xb88   :  { %1203 = vadd.xlane.f32.xlu0 %v1202_v54 }
 0xb89   :  { %v1205_v56 = vsel %vm59_vm1, %v1201_v55, 0.0 }
 0xb8a   :  { %1206 = vadd.xlane.f32.xlu1 %v1205_v56 }
 0xc15   :  { %v1204_v17 = vpop.xlane.xlu0 %1203 }
 0xc16   :  { %v1208_v59 = vmul.f32 0.03125, %v1204_v17 }
 0xc17   :  { %v1207_v12 = vpop.xlane.xlu1 %1206 }
 0xc18   :  { %v1210_v2 = vadd.f32 1e-05, %v1208_v59  ;;  %v1209_v60 = vmul.f32 0.03125, %v1207_v12 }
 0xc1a   :  { %3084 = vrsqrt.f32 %v1210_v2  ;;  %v1211_v61 = vadd.f32 1e-05, %v1209_v60 }
 0xc1c   :  { %3086 = vrsqrt.f32 %v1211_v61 }
 0xc24   :  { %v3085_v6 = vpop.eup %3084 }
 0xc25   :  { %v1214_v10 = vmul.f32 %v3085_v6, %v1198_v4 }
 0xc26   :  { %v3087_v14 = vpop.eup %3086 }
 0xc27   :  { %v1220_v16 = vmul.f32 %v1219_v5, %v1214_v10  ;;  %v1215_v18 = vmul.f32 %v3087_v14, %v1199_v52 }
 0xc29   :  { %v1221_v19 = vmul.f32 %v1219_v5, %v1215_v18  ;;  %v3469_v20 = vadd.f32 %v1225_v13, %v1220_v16 }
 0xc2b   :  { %v3477_v24 = vadd.f32 %v1225_v13, %v1221_v19  ;;  %v3480_v27 = vadd.f32 %v1230_v21, %v3469_v20 }
 0xc2d   :  { %v3483_v9 = vadd.f32 %v1231_v22, %v3477_v24 }
 0xc2f   :  { %v1250_v28 = vpack.c.bf16 %v3483_v9, %v3480_v27 }
 0xc31   :  { %2728 = vmatmul.mubr.msk.bf16.vlgmr.msra.gmra.mrb[20].mxu1 %vm59_vm1, %v1250_v28 }
 0xd04   :  { %v1304_v30 = vpop.f32.mrb[20].mxu1 }
 0xd05   :  { %v3496_v31 = vadd.f32 %v1304_v30, %v1254_v29  ;;  %v2729_v32 = vpop.f32.mrb[21].mxu1 }
 0xd06   :  { %v1307_v33 = vpop.f32.mrb[22].mxu1 }
 0xd07   :  { %v3498_v34 = vadd.f32 %v1307_v33, %v1254_v29  ;;  %v2730_v37 = vpop.f32.mrb[23].mxu1  ;;  %2735 = vmatprep.mubr.msk.f32.mxu1 %vm110_vm2, %v3496_v31 }
 0xd09   :  { %v3504_v38 = vpack.i.bf16 %v3498_v34, %v3496_v31 }
 0xd0b   :  { %2975 = vrot.lane.b32.xlu1 %v3504_v38, %s3164_s7  ;;  %2970 = vrot.lane.b32.xlu0 %v3504_v38, %s3162_s30 }
 0xd0f   :  { %1513 = vrot.lane.b32.xlu1 %v3496_v31, %s3160_s28  ;;  %2980 = vrot.lane.b32.xlu0 %v3504_v38, %s3161_s29 }
 0xd13   :  { %1515 = vrot.lane.b32.xlu1 %v3498_v34, %s3160_s28  ;;  %1717 = vrot.lane.b32.xlu0 %v3496_v31, %s3163_s6 }
 0xd17   :  { %1719 = vrot.lane.b32.xlu1 %v3498_v34, %s3163_s6 }
 0xd7d   :  { %v2976_v8 = vpop.permute.xlu1 %2975  ;;  %v2971_v40 = vpop.permute.xlu0 %2970 }
 0xd7e   :  { %v2978_v41 = vunpack.i.h.bf16 %v2976_v8  ;;  %v2977_v42 = vunpack.i.l.bf16 %v2976_v8  ;;  %v2973_v43 = vunpack.i.h.bf16 %v2971_v40  ;;  %v2972_v44 = vunpack.i.l.bf16 %v2971_v40 }
 0xd80   :  { %v2865_v45 = vpack.c.bf16 %v2978_v41, %v2977_v42  ;;  %v2855_v46 = vpack.c.bf16 %v2973_v43, %v2972_v44 }
 0xd81   :  { %v1514_v47 = vpop.permute.xlu1 %1513  ;;  %v2981_v48 = vpop.permute.xlu0 %2980 }
 0xd82   :  { %v2983_v49 = vunpack.i.h.bf16 %v2981_v48  ;;  %v2982_v3 = vunpack.i.l.bf16 %v2981_v48  ;;  %2857 = vmatprep.subr.msk.bf16.mxu1 %vm3274_vm3, %v2855_v46  ;;  %2867 = vmatprep.subr.msk.bf16.mxu0 %vm3274_vm3, %v2865_v45 }
 0xd83   :  { %2749 = vmatprep.mubr.msk.f32.mxu0 %vm110_vm2, %v1514_v47  ;;  %2860 = vmatpush3.bf16.xpose.msk.msra.mxu1 %vm3274_vm3, %v2855_v46 }
 0xd84   :  { %v2875_v50 = vpack.c.bf16 %v2983_v49, %v2982_v3  ;;  %2870 = vmatpush3.bf16.xpose.msk.msra.mxu0 %vm3274_vm3, %v2865_v45 }
 0xd85   :  { %v1516_v4 = vpop.permute.xlu1 %1515  ;;  %v1718_v51 = vpop.permute.xlu0 %1717 }
 0xd86   :  { %2877 = vmatprep.subr.msk.bf16.mxu0 %vm3274_vm3, %v2875_v50 }
 0xd89   :  { %v1720_v52 = vpop.permute.xlu1 %1719 }
 0xd8a   :  { %2736 = vmatmul.mubr.msk.f32.vlgmr.msra.gmra.mrb[14].mxu1 %vm110_vm2, %v3498_v34 }
 0xd8b   :  { %2750 = vmatmul.mubr.msk.f32.vlgmr.msra.gmra.mrb[6].mxu0 %vm110_vm2, %v1516_v4 }
 0xd8c   :  { %2880 = vmatpush3.bf16.xpose.msk.msra.mxu0 %vm3274_vm3, %v2875_v50  ;;  %2763 = vmatprep.mubr.msk.f32.mxu0 %vm110_vm2, %v1718_v51 }
 0xd93   :  { %2764 = vmatmul.mubr.msk.f32.vlgmr.msra.gmra.mrb[16].mxu0 %vm110_vm2, %v1720_v52 }
 0xe5d   :  { %v2737_v53 = vpop.f32.mrb[14].mxu1 }
 0xe5e   :  { %v1401_v54 = vmul.f32 0.35355338, %v2737_v53  ;;  %v2751_v55 = vpop.f32.mrb[6].mxu0  ;;  %v1391_v56 = vpop.f32.mrb[15].mxu1 }
 0xe5f   :  { %v1400_v17 = vmul.f32 0.35355338, %v1391_v56  ;;  %v1595_v59 = vpop.f32.mrb[7].mxu0  ;;  %v1605_v5 = vmul.f32 0.35355338, %v2751_v55 }
 0xe60   :  { %v1604_v12 = vmul.f32 0.35355338, %v1595_v59  ;;  %v1403_v2 = vadd.f32 %v1401_v54, %v3298_v36 }
 0xe61   :  { %v1402_v60 = vadd.f32 %v1400_v17, %v3303_v39  ;;  %v1607_v19 = vadd.f32 %v1605_v5, %v3298_v36 }
 0xe62   :  { %v1407_v61 = vsel %vm198_vm4, %v1403_v2, -inf  ;;  %v1606_v10 = vadd.f32 %v1604_v12, %v3303_v39 }
 0xe63   :  { %1408 = vmax.xlane.f32.xlu1 %v1407_v61  ;;  %v1404_v6 = vsel %vm198_vm4, %v1402_v60, -inf  ;;  %v1611_v28 = vsel %vm198_vm4, %v1607_v19, -inf }
 0xe64   :  { %1405 = vmax.xlane.f32.xlu0 %v1404_v6  ;;  %v1608_v18 = vsel %vm198_vm4, %v1606_v10, -inf }
 0xe66   :  { %v2765_v13 = vpop.f32.mrb[16].mxu0 }
 0xe67   :  { %v1809_v14 = vmul.f32 0.35355338, %v2765_v13  ;;  %v1799_v16 = vpop.f32.mrb[17].mxu0 }
 0xe68   :  { %v1808_v21 = vmul.f32 0.35355338, %v1799_v16  ;;  %1609 = vmax.xlane.f32.xlu0 %v1608_v18 }
 0xe69   :  { %v1811_v29 = vadd.f32 %v1809_v14, %v3298_v36 }
 0xe6a   :  { %v1810_v22 = vadd.f32 %v1808_v21, %v3303_v39 }
 0xe6b   :  { %v1815_v32 = vsel %vm198_vm4, %v1811_v29, -inf }
 0xe6c   :  { %v1812_v30 = vsel %vm198_vm4, %v1810_v22, -inf  ;;  %1612 = vmax.xlane.f32.xlu0 %v1611_v28 }
 0xe6d   :  { %1813 = vmax.xlane.f32.xlu1 %v1812_v30 }
 0xe70   :  { %1816 = vmax.xlane.f32.xlu0 %v1815_v32 }
 0xe7e   :  { %2985 = vrot.lane.b32.xlu1 %v3504_v38, %s3166_s13 }
 0xef0   :  { %v1409_v33 = vpop.xlane.xlu1 %1408 }
 0xef1   :  { %v1411_v37 = vsub.f32 %v1403_v2, %v1409_v33  ;;  %v1406_v8 = vpop.xlane.xlu0 %1405 }
 0xef2   :  { %v1410_v40 = vsub.f32 %v1402_v60, %v1406_v8 }
 0xef3   :  { %v1414_v41 = vmul.f32 1.442695, %v1411_v37 }
 0xef4   :  { %v1412_v39 = vmul.f32 1.442695, %v1410_v40 }
 0xef5   :  { %3088 = vpow2.f32 %v1414_v41  ;;  %v1610_v42 = vpop.xlane.xlu0 %1609 }
 0xef6   :  { %3090 = vpow2.f32 %v1412_v39  ;;  %v1614_v36 = vsub.f32 %v1606_v10, %v1610_v42 }
 0xef8   :  { %v1616_v43 = vmul.f32 1.442695, %v1614_v36 }
 0xef9   :  { %v1613_v44 = vpop.xlane.xlu0 %1612 }
 0xefa   :  { %3092 = vpow2.f32 %v1616_v43  ;;  %v1814_v45 = vpop.xlane.xlu1 %1813  ;;  %v1615_v46 = vsub.f32 %v1607_v19, %v1613_v44 }
 0xefb   :  { %v1818_v5 = vsub.f32 %v1810_v22, %v1814_v45 }
 0xefc   :  { %v1618_v47 = vmul.f32 1.442695, %v1615_v46 }
 0xefd   :  { %v1817_v48 = vpop.xlane.xlu0 %1816  ;;  %v1820_v6 = vmul.f32 1.442695, %v1818_v5 }
 0xefe   :  { %3094 = vpow2.f32 %v1618_v47  ;;  %v2986_v49 = vpop.permute.xlu1 %2985  ;;  %v1819_v3 = vsub.f32 %v1811_v29, %v1817_v48 }
 0xeff   :  { %v3089_v50 = vpop.eup %3088  ;;  %v2988_v4 = vunpack.i.h.bf16 %v2986_v49  ;;  %v2987_v51 = vunpack.i.l.bf16 %v2986_v49 }
 0xf00   :  { %v3091_v52 = vpop.eup %3090  ;;  %v1822_v53 = vmul.f32 1.442695, %v1819_v3  ;;  %v1419_v54 = vsel %vm198_vm4, %v3089_v50, 0.0 }
 0xf01   :  { %v2861_v55 = vpack.c.bf16 %v2988_v4, %v2987_v51  ;;  %1420 = vadd.xlane.f32.xlu0 %v1419_v54  ;;  %v1416_v56 = vsel %vm198_vm4, %v3091_v52, 0.0 }
 0xf02   :  { %3096 = vpow2.f32 %v1822_v53  ;;  %1417 = vadd.xlane.f32.xlu1 %v1416_v56 }
 0xf03   :  { %2862 = vmatprep.subr.bf16.mxu1 %v2861_v55  ;;  %3098 = vpow2.f32 %v1820_v6  ;;  %v3132_v6 = vld [vmem:[%s3691_s1 + $0x8] sm:$0xff] }
 0xf04   :  { %v3093_v17 = vpop.eup %3092  ;;  %2864 = vmatpush3.bf16.msra.mxu1 %v2861_v55 }
 0xf05   :  { %v1620_v59 = vsel %vm198_vm4, %v3093_v17, 0.0 }
 0xf06   :  { %1621 = vadd.xlane.f32.xlu1 %v1620_v59 }
 0xf08   :  { %v3095_v12 = vpop.eup %3094 }
 0xf09   :  { %v1623_v2 = vsel %vm198_vm4, %v3095_v12, 0.0 }
 0xf0a   :  { %1624 = vadd.xlane.f32.xlu0 %v1623_v2 }
 0xf0c   :  { %v3097_v60 = vpop.eup %3096 }
 0xf0d   :  { %v1827_v61 = vsel %vm198_vm4, %v3097_v60, 0.0  ;;  %v3099_v10 = vpop.eup %3098 }
 0xf0e   :  { %1828 = vadd.xlane.f32.xlu0 %v1827_v61  ;;  %v1824_v13 = vsel %vm198_vm4, %v3099_v10, 0.0 }
 0xf17   :  { %2995 = vrot.lane.b32.xlu1 %v3504_v38, %s3167_s14 }
 0xf1b   :  { %3000 = vrot.lane.b32.xlu1 %v3504_v38, %s3168_s15 }
 0xf24   :  { %2990 = vrot.lane.b32.xlu0 %v3504_v38, %s3165_s12 }
 0xf28   :  { %1921 = vrot.lane.b32.xlu0 %v3496_v31, %s3169_s16 }
 0xf3f   :  { %1825 = vadd.xlane.f32.xlu1 %v1824_v13  ;;  %v3133_v13 = vld [vmem:[%s3691_s1] sm:$0xff] }
 0xf50   :  { %1923 = vrot.lane.b32.xlu1 %v3498_v34, %s3169_s16 }
 0xf8e   :  { %v1421_v14 = vpop.xlane.xlu0 %1420 }
 0xf8f   :  { %3100 = vrcp.f32 %v1421_v14  ;;  %v1418_v16 = vpop.xlane.xlu1 %1417 }
 0xf90   :  { %3102 = vrcp.f32 %v1418_v16 }
 0xf93   :  { %v1622_v18 = vpop.xlane.xlu1 %1621 }
 0xf94   :  { %3104 = vrcp.f32 %v1622_v18 }
 0xf97   :  { %v1625_v19 = vpop.xlane.xlu0 %1624  ;;  %v2996_v22 = vpop.permute.xlu1 %2995 }
 0xf98   :  { %3106 = vrcp.f32 %v1625_v19  ;;  %v2998_v37 = vunpack.i.h.bf16 %v2996_v22  ;;  %v2997_v8 = vunpack.i.l.bf16 %v2996_v22 }
 0xf99   :  { %v3101_v21 = vpop.eup %3100 }
 0xf9a   :  { %v3103_v31 = vpop.eup %3102  ;;  %v1425_v30 = vmul.f32 %v3101_v21, %v3089_v50  ;;  %v2881_v43 = vpack.c.bf16 %v2998_v37, %v2997_v8 }
 0xf9b   :  { %v1829_v28 = vpop.xlane.xlu0 %1828  ;;  %v1424_v29 = vmul.f32 %v3103_v31, %v3091_v52  ;;  %v3001_v39 = vpop.permute.xlu1 %3000 }
 0xf9c   :  { %v3003_v44 = vunpack.i.h.bf16 %v3001_v39  ;;  %v3002_v45 = vunpack.i.l.bf16 %v3001_v39  ;;  %3108 = vrcp.f32 %v1829_v28 }
 0xf9d   :  { %2742 = vmatprep.mubr.msk.f32.mxu1 %vm198_vm4, %v1424_v29 }
 0xf9e   :  { %v3105_v32 = vpop.eup %3104  ;;  %2743 = vmatmul.mubr.msk.f32.vlgmr.msra.gmra.mrb[24].mxu1 %vm198_vm4, %v1425_v30  ;;  %v2885_v47 = vpack.c.bf16 %v3003_v44, %v3002_v45 }
 0xf9f   :  { %v2991_v34 = vpop.permute.xlu0 %2990  ;;  %v1628_v33 = vmul.f32 %v3105_v32, %v3093_v17 }
 0xfa0   :  { %v2993_v40 = vunpack.i.h.bf16 %v2991_v34  ;;  %v2992_v41 = vunpack.i.l.bf16 %v2991_v34 }
 0xfa1   :  { %2756 = vmatprep.mubr.msk.f32.mxu1 %vm198_vm4, %v1628_v33 }
 0xfa2   :  { %v2871_v42 = vpack.c.bf16 %v2993_v40, %v2992_v41  ;;  %v3107_v36 = vpop.eup %3106 }
 0xfa3   :  { %v1629_v46 = vmul.f32 %v3107_v36, %v3095_v12  ;;  %v1922_v51 = vpop.permute.xlu0 %1921 }
 0xfa4   :  { %2872 = vmatprep.subr.bf16.mxu1 %v2871_v42 }
 0xfa5   :  { %2874 = vmatpush3.bf16.msra.mxu1 %v2871_v42 }
 0xfa6   :  { %2882 = vmatprep.subr.bf16.mxu1 %v2881_v43  ;;  %v3109_v49 = vpop.eup %3108 }
 0xfa7   :  { %v1833_v4 = vmul.f32 %v3109_v49, %v3097_v60 }
 0xfa8   :  { %2757 = vmatmul.mubr.msk.f32.vlgmr.msra.gmra.mrb[26].mxu1 %vm198_vm4, %v1629_v46 }
 0xfa9   :  { %2884 = vmatpush3.bf16.msra.mxu1 %v2881_v43 }
 0xfaa   :  { %2887 = vmatprep.subr.msk.bf16.mxu1 %vm3274_vm3, %v2885_v47 }
 0xfcc   :  { %v1826_v48 = vpop.xlane.xlu1 %1825 }
 0xfcd   :  { %3110 = vrcp.f32 %v1826_v48 }
 0xfd0   :  { %v1924_v52 = vpop.permute.xlu1 %1923 }
 0xfd7   :  { %v3111_v3 = vpop.eup %3110 }
 0xfd8   :  { %v1832_v50 = vmul.f32 %v3111_v3, %v3099_v10 }
 0xfda   :  { %2770 = vmatprep.mubr.msk.f32.mxu1 %vm198_vm4, %v1832_v50 }
 0xfdb   :  { %2771 = vmatmul.mubr.msk.f32.vlgmr.msra.gmra.mrb[28].mxu1 %vm198_vm4, %v1833_v4 }
 0xfdc   :  { %2890 = vmatpush3.bf16.xpose.msk.msra.mxu1 %vm3274_vm3, %v2885_v47  ;;  %2777 = vmatprep.mubr.msk.f32.mxu1 %vm110_vm2, %v1922_v51 }
 0xfdd   :  { %2795 = vmatprep.subr.bf16.mxu1 %v3158_v1 }
 0xfe3   :  { %2778 = vmatmul.mubr.msk.f32.vlgmr.msra.gmra.mrb[30].mxu1 %vm110_vm2, %v1924_v52 }
 0xfe4   :  { %2799 = vmatprep.mubr.msk.bf16.mxu1 %vm3159_vm0, %v3158_v1 }
0x1071   :  { %v2744_v53 = vpop.f32.mrb[24].mxu1 }
0x1072   :  { %v1504_v54 = vpop.f32.mrb[25].mxu1 }
0x107b   :  { %v2758_v55 = vpop.f32.mrb[26].mxu1 }
0x107c   :  { %v1708_v56 = vpop.f32.mrb[27].mxu1 }
0x107d   :  { %v3009_v17 = vpack.i.bf16 %v2758_v55, %v1708_v56 }
0x10ae   :  { %v2772_v59 = vpop.f32.mrb[28].mxu1 }
0x10af   :  { %v1912_v12 = vpop.f32.mrb[29].mxu1 }
0x10b0   :  { %v3014_v2 = vpack.i.bf16 %v2772_v59, %v1912_v12 }
0x10b6   :  { %v2779_v23 = vpop.f32.mrb[30].mxu1 }
0x10b7   :  { %v2013_v60 = vmul.f32 0.35355338, %v2779_v23  ;;  %v2003_v61 = vpop.f32.mrb[31].mxu1 }
0x10b8   :  { %v2012_v5 = vmul.f32 0.35355338, %v2003_v61 }
0x10b9   :  { %v2015_v10 = vadd.f32 %v3132_v6, %v2013_v60  ;;  %v2159_v60 = vrot.slane %v3491_v26, %v954_v25 }
0x10ba   :  { %v2014_v14 = vadd.f32 %v3133_v13, %v2012_v5 }
0x10bb   :  { %v2019_v16 = vsel %vm198_vm4, %v2015_v10, -inf }
0x10bc   :  { %2020 = vmax.xlane.f32.xlu1 %v2019_v16  ;;  %v2016_v18 = vsel %vm198_vm4, %v2014_v14, -inf }
0x10bd   :  { %2017 = vmax.xlane.f32.xlu0 %v2016_v18 }
0x10cd   :  { %3005 = vrot.lane.b32.xlu1 %v3504_v38, %s3172_s23 }
0x10d1   :  { %3010 = vrot.lane.b32.xlu1 %v3009_v17, %s3171_s22 }
0x10d5   :  { %3015 = vrot.lane.b32.xlu1 %v3014_v2, %s3173_s24 }
0x10d9   :  { %2162 = vrot.lane.b32.xlu1 %v3457_v58, %s3170_s21 }
0x1149   :  { %v2021_v19 = vpop.xlane.xlu1 %2020 }
0x114a   :  { %v2023_v21 = vsub.f32 %v2015_v10, %v2021_v19  ;;  %v2018_v31 = vpop.xlane.xlu0 %2017 }
0x114b   :  { %v2022_v22 = vsub.f32 %v2014_v14, %v2018_v31 }
0x114c   :  { %v2026_v28 = vmul.f32 1.442695, %v2023_v21 }
0x114d   :  { %v2024_v29 = vmul.f32 1.442695, %v2022_v22  ;;  %v3006_v30 = vpop.permute.xlu1 %3005 }
0x114e   :  { %v3008_v32 = vunpack.i.h.bf16 %v3006_v30  ;;  %v3007_v34 = vunpack.i.l.bf16 %v3006_v30 }
0x114f   :  { %3112 = vpow2.f32 %v2024_v29 }
0x1150   :  { %v2891_v33 = vpack.c.bf16 %v3008_v32, %v3007_v34  ;;  %3114 = vpow2.f32 %v2026_v28 }
0x1151   :  { %v3011_v38 = vpop.permute.xlu1 %3010 }
0x1152   :  { %v3013_v37 = vunpack.i.h.bf16 %v3011_v38  ;;  %v3012_v8 = vunpack.i.l.bf16 %v3011_v38  ;;  %2892 = vmatprep.subr.bf16.mxu0 %v2891_v33  ;;  %v3039_v38 = vld [vmem:[%s3692_s2 + $0x34] ss:$8 sps:$4 sm:$0xff]  }
0x1153   :  { %2894 = vmatpush3.bf16.msra.mxu0 %v2891_v33 }
0x1154   :  { %v2150_v40 = vsel %vm110_vm2, %v2744_v53, %v3013_v37  ;;  %v2149_v58 = vsel %vm110_vm2, %v1504_v54, %v3012_v8  ;;  %2787 = vmatprep.subr.bf16.mxu0 %v3158_v1 }
0x1159   :  { %v3113_v41 = vpop.eup %3112 }
0x115a   :  { %v2028_v39 = vsel %vm198_vm4, %v3113_v41, 0.0  ;;  %v3115_v42 = vpop.eup %3114 }
0x115b   :  { %2029 = vadd.xlane.f32.xlu0 %v2028_v39  ;;  %v2031_v36 = vsel %vm198_vm4, %v3115_v42, 0.0 }
0x115f   :  { %2032 = vadd.xlane.f32.xlu0 %v2031_v36  ;;  %v2241_v36 = vrot.slane %v3491_v26, %v1037_v15  ;;  %v3041_v15 = vld [vmem:[%s3693_s3 + $0x28] sm:$0xff]  }
0x1175   :  { %2160 = vrot.lane.b32.xlu0 %v3451_v57, %s3170_s21  ;;  %v3016_v57 = vpop.permute.xlu1 %3015 }
0x1176   :  { %v3018_v52 = vunpack.i.h.bf16 %v3016_v57  ;;  %v3017_v53 = vunpack.i.l.bf16 %v3016_v57 }
0x1178   :  { %v2151_v17 = vsel %vm198_vm4, %v2149_v58, %v3017_v53  ;;  %v2152_v59 = vsel %vm198_vm4, %v2150_v40, %v3018_v52 }
0x1179   :  { %v2163_v3 = vpop.permute.xlu1 %2162 }
0x11e8   :  { %v2030_v43 = vpop.xlane.xlu0 %2029 }
0x11e9   :  { %3116 = vrcp.f32 %v2030_v43 }
0x11ec   :  { %v2033_v44 = vpop.xlane.xlu0 %2032 }
0x11ed   :  { %3118 = vrcp.f32 %v2033_v44 }
0x11f0   :  { %v2161_v49 = vpop.permute.xlu0 %2160 }
0x11f3   :  { %v3117_v45 = vpop.eup %3116 }
0x11f4   :  { %v2036_v46 = vmul.f32 %v3117_v45, %v3113_v41 }
0x11f6   :  { %2784 = vmatprep.mubr.msk.f32.mxu0 %vm198_vm4, %v2036_v46 }
0x11f7   :  { %v3119_v47 = vpop.eup %3118 }
0x11f8   :  { %v2037_v48 = vmul.f32 %v3119_v47, %v3115_v42  ;;  %v2247_v47 = vrot.slane %v3491_v26, %v1043_v0  ;;  %v3042_v0 = vld [vmem:[%s3693_s3 + $0x30] sm:$0xff]  }
0x11fa   :  { %2785 = vmatmul.mubr.msk.f32.vlgmr.msra.gmra.mrb[18].mxu0 %vm198_vm4, %v2037_v48 }
0x11fb   :  { %2791 = vmatprep.mubr.msk.bf16.mxu0 %vm3159_vm0, %v3158_v1  ;;  %2788 = vmatpush3.bf16.msra.mxu0 %v2161_v49 }
0x11fc   :  { %2789 = vmatprep.subr.bf16.mxu0 %v3158_v1 }
0x11ff   :  { %2790 = vmatpush3.bf16.msra.mxu0 %v2163_v3 }
0x1200   :  { %2803 = vmatprep.subr.bf16.mxu0 %v3158_v1 }
0x12cd   :  { %v2786_v50 = vpop.f32.mrb[18].mxu0 }
0x12ce   :  { %v2116_v4 = vpop.f32.mrb[19].mxu0 }
0x12cf   :  { %v3019_v51 = vpack.i.bf16 %v2786_v50, %v2116_v4  ;;  %v3040_v50 = vld [vmem:[%s3693_s3 + $0x20] sm:$0xff]   ;;  %v3043_v4 = vld [vmem:[%s3693_s3 + $0x38] sm:$0xff]   ;;  %s3175_s3 = smov [#allocation2]  }
0x12d0   :  { %s2441_s24 = sshll.u32 %s3175_s3, 4  ;;  %s2442_s24 = int_to_ptr.vmem [resolvable:$true] %s2441_s24 }
0x12d1   :  { %3020 = vrot.lane.b32.xlu0 %v3019_v51, %s3174_s25  ;;  %v2254_v51 = vrot.slane %v3491_v26, %v1050_v11  ;;  %v2321_v11 = vrot.slane %v3491_v26, %v1117_v35  ;;  %s3134_s25 = scalar_lea.vmem %s2442_s24, 256  ;;  %p3139_p1 = scmp.lt.s32.totalorder %s2442_s24, %s2442_s24 }
0x12d2   :  { %p3135_p0 = scmp.ne.s32.totalorder %s2442_s24, %s3134_s25  ;;  %p3140_p2 = scmp.lt.s32.totalorder %s3134_s25, %s3134_s25 }
0x12d4   :  { %p3141_p3 = por %p3140_p2, %p3139_p1 }
0x12d6   :  { %p3142_p4 = pnand %p3141_p3, %p3135_p0 }
0x1343   :  { %v3021_v54 = vpop.permute.xlu0 %3020 }
0x1344   :  { %v3023_v55 = vunpack.i.h.bf16 %v3021_v54  ;;  %v3022_v56 = vunpack.i.l.bf16 %v3021_v54 }
0x1346   :  { %v2154_v12 = vsel %vm948_vm5, %v2152_v59, %v3023_v55  ;;  %v2153_v2 = vsel %vm948_vm5, %v2151_v17, %v3022_v56 }
0x1347   :  { %v2155_v23 = vpack.c.bf16 %v2154_v12, %v2153_v2 }
0x1349   :  { %2792 = vmatmul.mubr.msk.bf16.vlgmr.msra.gmra.mrb[20].mxu0 %vm59_vm1, %v2155_v23 }
0x134a   :  { %2811 = vmatprep.mubr.msk.bf16.mxu0 %vm3159_vm0, %v3158_v1  ;;  %2804 = vmatpush3.bf16.msra.mxu0 %v3040_v50 }
0x134b   :  { %2805 = vmatprep.subr.bf16.mxu0 %v3158_v1 }
0x134e   :  { %2806 = vmatpush3.bf16.msra.mxu0 %v3041_v15 }
0x134f   :  { %2807 = vmatprep.subr.bf16.mxu0 %v3158_v1 }
0x1352   :  { %2808 = vmatpush3.bf16.msra.mxu0 %v3042_v0 }
0x1353   :  { %2809 = vmatprep.subr.bf16.mxu0 %v3158_v1 }
0x1356   :  { %2810 = vmatpush3.bf16.msra.mxu0 %v3043_v4 }
0x141c   :  { %v2203_v61 = vpop.f32.mrb[20].mxu0 }
0x141d   :  { %v2204_v5 = vadd.f32 %v2203_v61, %v2159_v60  ;;  %v2793_v6 = vpop.f32.mrb[21].mxu0 }
0x141e   :  { %v2206_v10 = vpop.f32.mrb[22].mxu0 }
0x141f   :  { %v2207_v13 = vadd.f32 %v2206_v10, %v2159_v60  ;;  %v2794_v14 = vpop.f32.mrb[23].mxu0  ;;  %v2210_v16 = vadd.f32 %v2204_v5, %v3480_v27 }
0x1421   :  { %v2212_v18 = vsel %vm59_vm1, %v2210_v16, 0.0  ;;  %v2211_v19 = vadd.f32 %v2207_v13, %v3483_v9  ;;  %v3038_v9 = vld [vmem:[%s3692_s2 + $0x24] ss:$8 sps:$4 sm:$0xff]  }
0x1422   :  { %2213 = vadd.xlane.f32.xlu0 %v2212_v18  ;;  %2796 = vmatpush3.bf16.msra.mxu1 %v3038_v9 }
0x1423   :  { %v2215_v21 = vsel %vm59_vm1, %v2211_v19, 0.0  ;;  %2797 = vmatprep.subr.bf16.mxu1 %v3158_v1 }
0x1424   :  { %2216 = vadd.xlane.f32.xlu1 %v2215_v21 }
0x1426   :  { %2798 = vmatpush3.bf16.msra.mxu1 %v3039_v38 }
0x14af   :  { %v2214_v31 = vpop.xlane.xlu0 %2213 }
0x14b0   :  { %v2218_v22 = vmul.f32 0.03125, %v2214_v31 }
0x14b1   :  { %v2217_v28 = vpop.xlane.xlu1 %2216 }
0x14b2   :  { %v2220_v25 = vsub.f32 %v2210_v16, %v2218_v22  ;;  %v2219_v29 = vmul.f32 0.03125, %v2217_v28 }
0x14b4   :  { %v2221_v30 = vsub.f32 %v2211_v19, %v2219_v29  ;;  %v2222_v32 = vmul.f32 %v2220_v25, %v2220_v25 }
0x14b6   :  { %v2224_v34 = vsel %vm59_vm1, %v2222_v32, 0.0  ;;  %v2223_v33 = vmul.f32 %v2221_v30, %v2221_v30 }
0x14b7   :  { %2225 = vadd.xlane.f32.xlu0 %v2224_v34 }
0x14b8   :  { %v2227_v27 = vsel %vm59_vm1, %v2223_v33, 0.0 }
0x14bb   :  { %2228 = vadd.xlane.f32.xlu0 %v2227_v27 }
0x1544   :  { %v2226_v37 = vpop.xlane.xlu0 %2225 }
0x1545   :  { %v2230_v8 = vmul.f32 0.03125, %v2226_v37 }
0x1547   :  { %v2232_v40 = vadd.f32 1e-05, %v2230_v8 }
0x1548   :  { %v2229_v58 = vpop.xlane.xlu0 %2228 }
0x1549   :  { %3120 = vrsqrt.f32 %v2232_v40  ;;  %v2231_v41 = vmul.f32 0.03125, %v2229_v58 }
0x154b   :  { %v2233_v39 = vadd.f32 1e-05, %v2231_v41 }
0x154d   :  { %3122 = vrsqrt.f32 %v2233_v39 }
0x1553   :  { %v3121_v42 = vpop.eup %3120 }
0x1554   :  { %v2236_v43 = vmul.f32 %v3121_v42, %v2220_v25 }
0x1556   :  { %v2242_v45 = vmul.f32 %v2241_v36, %v2236_v43  ;;  %v2421_v43 = vrot.slane %v3491_v26, %v1218_v62 }
0x1557   :  { %v3123_v44 = vpop.eup %3122 }
0x1558   :  { %v2237_v46 = vmul.f32 %v3123_v44, %v2221_v30  ;;  %v2248_v49 = vadd.f32 %v2247_v47, %v2242_v45 }
0x155a   :  { %v2243_v48 = vmul.f32 %v2241_v36, %v2237_v46  ;;  %v2427_v46 = vrot.slane %v3491_v26, %v1224_v63 }
0x155c   :  { %v2249_v57 = vadd.f32 %v2247_v47, %v2243_v48 }
0x155e   :  { %v2250_v3 = vpack.c.bf16 %v2249_v57, %v2248_v49 }
0x1560   :  { %2800 = vmatmul.mubr.msk.bf16.vlgmr.msra.gmra.mrb[32].mxu1 %vm59_vm1, %v2250_v3 }
0x1633   :  { %v2300_v52 = vpop.f32.mrb[32].mxu1 }
0x1634   :  { %v2301_v53 = vadd.f32 %v2300_v52, %v2254_v51  ;;  %v2801_v54 = vpop.f32.mrb[33].mxu1 }
0x1635   :  { %v2303_v55 = vpop.f32.mrb[34].mxu1 }
0x1636   :  { %v2309_v56 = vmul.f32 0.70710677, %v2301_v53  ;;  %v2304_v17 = vadd.f32 %v2303_v55, %v2254_v51  ;;  %v2802_v59 = vpop.f32.mrb[35].mxu1  ;;  %v2307_v60 = vmul.f32 0.5, %v2301_v53 }
0x1638   :  { %3124 = verf.f32 %v2309_v56  ;;  %v2310_v12 = vmul.f32 0.70710677, %v2304_v17  ;;  %v2308_v61 = vmul.f32 0.5, %v2304_v17 }
0x163a   :  { %3126 = verf.f32 %v2310_v12 }
0x1642   :  { %v3125_v1 = vpop.eup %3124 }
0x1643   :  { %v2313_v2 = vadd.f32 1.0, %v3125_v1 }
0x1644   :  { %v3127_v23 = vpop.eup %3126 }
0x1645   :  { %v2314_v5 = vadd.f32 1.0, %v3127_v23  ;;  %v2315_v6 = vmul.f32 %v2313_v2, %v2307_v60 }
0x1647   :  { %v2316_v10 = vmul.f32 %v2314_v5, %v2308_v61 }
0x1649   :  { %v2317_v13 = vpack.c.bf16 %v2316_v10, %v2315_v6 }
0x164b   :  { %2812 = vmatmul.mubr.msk.bf16.vlgmr.msra.gmra.mrb[24].mxu0 %vm1143_vm6, %v2317_v13 }
0x171e   :  { %v2383_v14 = vpop.f32.mrb[24].mxu0 }
0x171f   :  { %v2384_v16 = vadd.f32 %v2383_v14, %v2321_v11  ;;  %v2813_v18 = vpop.f32.mrb[25].mxu0 }
0x1720   :  { %v2386_v19 = vpop.f32.mrb[26].mxu0 }
0x1721   :  { %v2387_v21 = vadd.f32 %v2386_v19, %v2321_v11  ;;  %v2814_v31 = vpop.f32.mrb[27].mxu0  ;;  %v2390_v22 = vadd.f32 %v2384_v16, %v2248_v49 }
0x1723   :  { %v2392_v28 = vsel %vm59_vm1, %v2390_v22, 0.0  ;;  %v2391_v25 = vadd.f32 %v2387_v21, %v2249_v57 }
0x1724   :  { %2393 = vadd.xlane.f32.xlu1 %v2392_v28 }
0x1725   :  { %v2395_v29 = vsel %vm59_vm1, %v2391_v25, 0.0 }
0x1726   :  { %2396 = vadd.xlane.f32.xlu0 %v2395_v29 }
0x17b1   :  { %v2394_v30 = vpop.xlane.xlu1 %2393 }
0x17b2   :  { %v2398_v32 = vmul.f32 0.03125, %v2394_v30 }
0x17b3   :  { %v2397_v34 = vpop.xlane.xlu0 %2396 }
0x17b4   :  { %v2400_v33 = vsub.f32 %v2390_v22, %v2398_v32  ;;  %v2399_v27 = vmul.f32 0.03125, %v2397_v34 }
0x17b6   :  { %v2401_v35 = vsub.f32 %v2391_v25, %v2399_v27  ;;  %v2402_v9 = vmul.f32 %v2400_v33, %v2400_v33 }
0x17b8   :  { %v2404_v38 = vsel %vm59_vm1, %v2402_v9, 0.0  ;;  %v2403_v37 = vmul.f32 %v2401_v35, %v2401_v35 }
0x17b9   :  { %2405 = vadd.xlane.f32.xlu1 %v2404_v38 }
0x17ba   :  { %v2407_v8 = vsel %vm59_vm1, %v2403_v37, 0.0 }
0x17bb   :  { %2408 = vadd.xlane.f32.xlu0 %v2407_v8 }
0x1846   :  { %v2406_v40 = vpop.xlane.xlu1 %2405 }
0x1847   :  { %v2410_v58 = vmul.f32 0.03125, %v2406_v40 }
0x1848   :  { %v2409_v41 = vpop.xlane.xlu0 %2408 }
0x1849   :  { %v2412_v39 = vadd.f32 1e-05, %v2410_v58  ;;  %v2411_v42 = vmul.f32 0.03125, %v2409_v41 }
0x184b   :  { %3128 = vrsqrt.f32 %v2412_v39  ;;  %v2413_v36 = vadd.f32 1e-05, %v2411_v42 }
0x184d   :  { %3130 = vrsqrt.f32 %v2413_v36 }
0x1855   :  { %v3129_v44 = vpop.eup %3128 }
0x1856   :  { %v2416_v45 = vmul.f32 %v3129_v44, %v2400_v33 }
0x1857   :  { %v3131_v47 = vpop.eup %3130 }
0x1858   :  { %v2422_v48 = vmul.f32 %v2421_v43, %v2416_v45  ;;  %v2417_v49 = vmul.f32 %v3131_v47, %v2401_v35 }
0x185a   :  { %v2423_v57 = vmul.f32 %v2421_v43, %v2417_v49  ;;  %v2428_v3 = vadd.f32 %v2427_v46, %v2422_v48 }
0x185c   :  { %v2429_v50 = vadd.f32 %v2427_v46, %v2423_v57  ;;  %v2430_v15 = vadd.f32 %v2428_v3, %v3469_v20 }
0x185e   :  { %v2431_v0 = vadd.f32 %v2429_v50, %v3477_v24  ;;  %v2432_v4 = vmul.f32 0.5, %v2430_v15 }
0x1860   :  { %v2433_v62 = vmul.f32 0.5, %v2431_v0  ;;  %2434 = vst.msk [vmem:[#allocation2] sm:$0xff] %vm59_vm1, %v2432_v4 }
0x1862   :  { %2435 = vst.msk [vmem:[#allocation2 + $0x8] sm:$0xff] %vm59_vm1, %v2433_v62 }
0x1863   :  { %3145 = shalt.err (!%p3142_p4)
}
0x1864   :  { %s3146_s26 = scalar_lea.hbm %s3695_s5, 256 }
0x1865   :  { %p3147_p5 = scmp.ne.s32.totalorder %s3695_s5, %s3146_s26  ;;  %p3150_p6 = scmp.lt.u32.totalorder %s3146_s26, %s3695_s5 }
0x1867   :  { %p3152_p7 = pnand %p3150_p6, %p3147_p5 }
0x1869   :  { %3155 = shalt.err (!%p3152_p7)
}
0x186a   :  { %s3176_s11 = smov 128  }
0x186b   :  { %2447 = dma.vmem_to_hbm [thread:$0]  %s2442_s24, 256, %s3695_s5, [#allocation3], %s3176_s11, %s3176_s11, %s3171_s22  }
0x186c   :  { %3156 = dma.done.wait [#allocation3], 256  }
0x186d   :  { %3157 = vsyncadd [#allocation3], 4294967040 }
0x186e   :  { %2451 = vsyncpa [#allocation3], 1 }

</bundles_post_ra>
